<compile_context>
chip_gen: v5e
topology: v5e:2x2
jax: 0.10.0
libtpu: 0.0.40
codegen_flags: <defaults>
</compile_context>

<pallas_src>
import numpy as np
import jax
import jax.numpy as jnp
from jax.experimental import pallas as pl
from jax.experimental.pallas import tpu as pltpu

# opcodes of the synthetic query program
OP_OPERAND = 0
OP_PROJ = 1
OP_INT = 2
OP_UNION = 3
OP_NEG = 4
OP_STOP = 5

STACK_SIZE = 2   # HeuristicBaseline.stack_size
BLOCK_B = 8      # batch rows per block == sublane width of a vreg
BLOCK_N = 512    # node-lane tile (multiple of 128); bounds VMEM for large graphs

# nn.Parameter(torch.zeros(1)) -- unused by the forward math, kept for parity.
DUMMY_PARAM = jnp.zeros((1,), jnp.float32)


def _round_up(x, m):
    return ((x + m - 1) // m) * m


# ----------------------------------------------------------------------------
# Fused Pallas kernel: full interpreter loop + final logit for one
# (BLOCK_B rows) x (node lane tile) block.
# ----------------------------------------------------------------------------
def _fused_kernel(ops_ref, args_ref, rel_ref, rand_ref, out_ref):
    Bt, L = ops_ref.shape        # (BLOCK_B, max_len)
    Rp, Nt = rel_ref.shape       # (num_rel padded to 8, node lane tile)

    n_off = pl.program_id(1) * Nt          # global lane offset of this node tile

    opsv = ops_ref[...]          # (Bt, L) int32
    argsv = args_ref[...]        # (Bt, L) int32
    rel = rel_ref[...]           # (Rp, Nt) f32, resident in VMEM for all steps

    # entity one-hot lanes carry GLOBAL node indices for this tile
    lane_n = jax.lax.broadcasted_iota(jnp.int32, (Bt, Nt), 1) + n_off
    rel_iota = jax.lax.broadcasted_iota(jnp.int32, (Bt, Rp), 1)

    # Stack (2 slots) lives entirely in registers/VMEM values across the loop.
    x0 = jnp.zeros((Bt, Nt), jnp.float32)
    x1 = jnp.zeros((Bt, Nt), jnp.float32)
    spv = jnp.zeros((Bt, 1), jnp.int32)       # per-row stack pointer (next free slot)
    halted = jnp.zeros((Bt, 1), jnp.bool_)    # per-row "seen STOP" flag

    # Fixed trip-count, fully unrolled interpreter loop (L is a small static int).
    for s in range(L):
        opc = opsv[:, s:s + 1]                # (Bt, 1) int32
        idx = argsv[:, s:s + 1]               # (Bt, 1) int32

        active = jnp.logical_not(halted)
        is_operand = (opc == OP_OPERAND) & active
        is_proj = (opc == OP_PROJ) & active
        is_int = (opc == OP_INT) & active
        is_uni = (opc == OP_UNION) & active
        is_neg = (opc == OP_NEG) & active
        halted = halted | (opc == OP_STOP)

        # one_hot(h_index, num_node) restricted to this lane tile (operand pushes)
        onehot_n = (lane_n == idx).astype(jnp.float32)               # (Bt, Nt)
        # relation->tail row gather as one-hot matmul (MXU, per-row index)
        onehot_r = (rel_iota == idx).astype(jnp.float32)             # (Bt, Rp)
        rel_row = jnp.dot(onehot_r, rel,
                          preferred_element_type=jnp.float32)        # (Bt, Nt)

        top = jnp.where(spv == 1, x0, x1)     # stack[sp-1] for sp in {1, 2}
        vmin = jnp.minimum(x0, x1)            # intersection (sp == 2)
        vmax = jnp.maximum(x0, x1)            # union        (sp == 2)

        value = jnp.where(is_operand, onehot_n,
                jnp.where(is_proj, rel_row,
                jnp.where(is_neg, 1.0 - top,
                jnp.where(is_int, vmin,
                jnp.where(is_uni, vmax, jnp.zeros_like(x0))))))

        # slot that receives `value`; -1 (no write) for stop / halted rows.
        target = jnp.where(is_operand, spv,
                 jnp.where(is_int | is_uni, 0,
                 jnp.where(is_neg | is_proj, spv - 1, -1)))

        x0 = jnp.where(target == 0, value, x0)
        x1 = jnp.where(target == 1, value, x1)

        spv = spv + jnp.where(is_operand, 1,
                    jnp.where(is_int | is_uni, -1, 0)).astype(jnp.int32)

    # Epilogue: stack.pop(); noisy prob -> logit (fused; no second kernel launch).
    top = jnp.where(spv == 1, x0, x1)
    p = (top * 2.0 + rand_ref[...]) / 3.0
    out_ref[...] = jnp.log((p + 1e-10) / (1.0 - p + 1e-10))


# ----------------------------------------------------------------------------
# Forward pass wrapper: pad batch to BLOCK_B rows, relations to 8 sublanes,
# nodes to a multiple of the lane tile; 2-D parallel grid.
# ----------------------------------------------------------------------------
def heuristic_baseline_forward(ops, args, rel_tail, rand, *,
                               block_b=BLOCK_B, block_n=BLOCK_N):
    B, L = ops.shape
    R, N = rel_tail.shape

    Bp = _round_up(B, block_b)
    Rp = _round_up(R, 8)
    bn = min(block_n, _round_up(N, 128))     # lane tile (multiple of 128)
    Np = _round_up(N, bn)

    ops_p = jnp.full((Bp, L), OP_STOP, jnp.int32).at[:B].set(ops.astype(jnp.int32))
    args_p = jnp.zeros((Bp, L), jnp.int32).at[:B].set(args.astype(jnp.int32))
    rand_p = jnp.zeros((Bp, Np), jnp.float32).at[:B, :N].set(rand.astype(jnp.float32))
    rel_p = jnp.zeros((Rp, Np), jnp.float32).at[:R, :N].set(rel_tail.astype(jnp.float32))

    grid = (Bp // block_b, Np // bn)
    out = pl.pallas_call(
        _fused_kernel,
        out_shape=jax.ShapeDtypeStruct((Bp, Np), jnp.float32),
        grid=grid,
        in_specs=[
            pl.BlockSpec((block_b, L), lambda i, n: (i, 0)),   # ops (tiny, per-row program)
            pl.BlockSpec((block_b, L), lambda i, n: (i, 0)),   # args
            pl.BlockSpec((Rp, bn), lambda i, n: (0, n)),       # rel_tail lane tile
            pl.BlockSpec((block_b, bn), lambda i, n: (i, n)),  # rand
        ],
        out_specs=pl.BlockSpec((block_b, bn), lambda i, n: (i, n)),
        compiler_params=pltpu.CompilerParams(
            dimension_semantics=("parallel", "parallel")),
    )(ops_p, args_p, rel_p, rand_p)
    return out[:B, :N]


# ----------------------------------------------------------------------------
# Pure numpy reference (mirrors the PyTorch semantics).
# ----------------------------------------------------------------------------
def reference_forward(ops, args, rel_tail, rand):
    ops = np.asarray(ops); args = np.asarray(args)
    rel = np.asarray(rel_tail, np.float32); rand = np.asarray(rand, np.float32)
    B, L = ops.shape
    _, N = rel.shape
    out = np.zeros((B, N), np.float32)
    for b in range(B):
        stack = np.zeros((STACK_SIZE, N), np.float32)
        sp = 0
        ip = 0
        while ops[b, ip] != OP_STOP:
            o, a = int(ops[b, ip]), int(args[b, ip])
            if o == OP_OPERAND:
                v = np.zeros(N, np.float32); v[a] = 1.0
                stack[sp] = v; sp += 1
            elif o == OP_PROJ:
                stack[sp - 1] = rel[a]
            elif o == OP_NEG:
                stack[sp - 1] = 1.0 - stack[sp - 1]
            elif o == OP_INT:
                stack[sp - 2] = np.minimum(stack[sp - 2], stack[sp - 1]); sp -= 1
            elif o == OP_UNION:
                stack[sp - 2] = np.maximum(stack[sp - 2], stack[sp - 1]); sp -= 1
            ip += 1
        assert sp == 1, "More operands than expected"
        p = (stack[sp - 1] * np.float32(2.0) + rand[b].reshape(N)) / np.float32(3.0)
        out[b] = np.log((p + np.float32(1e-10)) / (np.float32(1.0) - p + np.float32(1e-10)))
    return out


if __name__ == "__main__":
    key = jax.random.PRNGKey(0)
    k_h, k_t, k_r, k_rand = jax.random.split(key, 4)

    num_node = 128   # graph.num_node
    num_rel = 4
    num_edges = 64
    batch = 4
    max_len = 8

    # Deterministic synthetic graph: only (relation -> tail) matters for this heuristic.
    heads = jax.random.randint(k_h, (num_edges,), 0, num_node)   # unused by heuristic
    tails = jax.random.randint(k_t, (num_edges,), 0, num_node)
    rels = jax.random.randint(k_r, (num_edges,), 0, num_rel)
    rel_tail = jnp.zeros((num_rel, num_node), jnp.float32).at[rels, tails].set(1.0)

    # Synthetic query programs (opcode, operand) padded with STOP.
    ops = jnp.array([
        [OP_OPERAND, OP_PROJ, OP_PROJ, OP_STOP, OP_STOP, OP_STOP, OP_STOP, OP_STOP],
        [OP_OPERAND, OP_PROJ, OP_OPERAND, OP_PROJ, OP_INT, OP_STOP, OP_STOP, OP_STOP],
        [OP_OPERAND, OP_PROJ, OP_NEG, OP_OPERAND, OP_PROJ, OP_UNION, OP_STOP, OP_STOP],
        [OP_OPERAND, OP_NEG, OP_STOP, OP_STOP, OP_STOP, OP_STOP, OP_STOP, OP_STOP],
    ], jnp.int32)
    args = jnp.array([
        [3, 1, 2, 0, 0, 0, 0, 0],
        [5, 0, 7, 1, 0, 0, 0, 0],
        [2, 0, 0, 9, 2, 0, 0, 0],
        [11, 0, 0, 0, 0, 0, 0, 0],
    ], jnp.int32)
    assert ops.shape == (batch, max_len)

    rand = jax.random.uniform(k_rand, (batch, num_node), jnp.float32)

    t_logit = heuristic_baseline_forward(ops, args, rel_tail, rand)
    t_logit = jax.block_until_ready(t_logit)

    ref = reference_forward(ops, args, rel_tail, rand)
    np.testing.assert_allclose(np.asarray(t_logit), ref, rtol=1e-4, atol=1e-4)

    print("KERNEL_OK")
</pallas_src>

<mosaic_0001>
module attributes {stable_mosaic.version = 11 : i64} {
  func.func @_fused_kernel(%arg0: i32, %arg1: i32, %arg2: memref<8x8xi32, #tpu.memory_space<vmem>>, %arg3: memref<8x8xi32, #tpu.memory_space<vmem>>, %arg4: memref<8x128xf32, #tpu.memory_space<vmem>>, %arg5: memref<8x128xf32, #tpu.memory_space<vmem>>, %arg6: memref<8x128xf32, #tpu.memory_space<vmem>>) attributes {dimension_semantics = [#tpu.dimension_semantics<parallel>, #tpu.dimension_semantics<parallel>], iteration_bounds = array<i64: 1, 1>, scalar_prefetch = 0 : i64, scratch_operands = 0 : i64, tpu.core_type = #tpu.core_type<tc>, window_params = [{transform_indices = @transform_0, window_bounds = array<i64: 8, 8>}, {transform_indices = @transform_1, window_bounds = array<i64: 8, 8>}, {transform_indices = @transform_2, window_bounds = array<i64: 8, 128>}, {transform_indices = @transform_3, window_bounds = array<i64: 8, 128>}, {transform_indices = @transform_4, window_bounds = array<i64: 8, 128>}]} {
    %c128_i32 = arith.constant 128 : i32
    %0 = arith.muli %arg1, %c128_i32 : i32
    %c0 = arith.constant 0 : index
    %c0_0 = arith.constant 0 : index
    %1 = vector.load %arg2[%c0, %c0_0] : memref<8x8xi32, #tpu.memory_space<vmem>>, vector<8x8xi32>
    %c0_1 = arith.constant 0 : index
    %c0_2 = arith.constant 0 : index
    %2 = vector.load %arg3[%c0_1, %c0_2] : memref<8x8xi32, #tpu.memory_space<vmem>>, vector<8x8xi32>
    %c0_3 = arith.constant 0 : index
    %c0_4 = arith.constant 0 : index
    %3 = vector.load %arg4[%c0_3, %c0_4] : memref<8x128xf32, #tpu.memory_space<vmem>>, vector<8x128xf32>
    %4 = tpu.iota {dimensions = array<i32: 1>} : vector<8x128xi32>
    %5 = vector.broadcast %0 : i32 to vector<8x128xi32>
    %6 = arith.addi %4, %5 : vector<8x128xi32>
    %7 = tpu.iota {dimensions = array<i32: 1>} : vector<8x8xi32>
    %cst = arith.constant 0.000000e+00 : f32
    %8 = vector.broadcast %cst : f32 to vector<8x128xf32>
    %cst_5 = arith.constant 0.000000e+00 : f32
    %9 = vector.broadcast %cst_5 : f32 to vector<8x128xf32>
    %c0_i32 = arith.constant 0 : i32
    %10 = vector.broadcast %c0_i32 : i32 to vector<8x1xi32>
    %false = arith.constant false
    %11 = vector.broadcast %false : i1 to vector<8x1xi1>
    %12 = vector.extract_strided_slice %1 {offsets = [0, 0], sizes = [8, 1], strides = [1, 1]} : vector<8x8xi32> to vector<8x1xi32>
    %13 = vector.extract_strided_slice %2 {offsets = [0, 0], sizes = [8, 1], strides = [1, 1]} : vector<8x8xi32> to vector<8x1xi32>
    %cst_6 = arith.constant dense<true> : vector<8x1xi1>
    %14 = arith.xori %11, %cst_6 : vector<8x1xi1>
    %c0_i32_7 = arith.constant 0 : i32
    %15 = vector.broadcast %c0_i32_7 : i32 to vector<8x1xi32>
    %16 = arith.cmpi eq, %12, %15 : vector<8x1xi32>
    %17 = arith.andi %16, %14 : vector<8x1xi1>
    %c1_i32 = arith.constant 1 : i32
    %18 = vector.broadcast %c1_i32 : i32 to vector<8x1xi32>
    %19 = arith.cmpi eq, %12, %18 : vector<8x1xi32>
    %20 = arith.andi %19, %14 : vector<8x1xi1>
    %c2_i32 = arith.constant 2 : i32
    %21 = vector.broadcast %c2_i32 : i32 to vector<8x1xi32>
    %22 = arith.cmpi eq, %12, %21 : vector<8x1xi32>
    %23 = arith.andi %22, %14 : vector<8x1xi1>
    %c3_i32 = arith.constant 3 : i32
    %24 = vector.broadcast %c3_i32 : i32 to vector<8x1xi32>
    %25 = arith.cmpi eq, %12, %24 : vector<8x1xi32>
    %26 = arith.andi %25, %14 : vector<8x1xi1>
    %c4_i32 = arith.constant 4 : i32
    %27 = vector.broadcast %c4_i32 : i32 to vector<8x1xi32>
    %28 = arith.cmpi eq, %12, %27 : vector<8x1xi32>
    %29 = arith.andi %28, %14 : vector<8x1xi1>
    %c5_i32 = arith.constant 5 : i32
    %30 = vector.broadcast %c5_i32 : i32 to vector<8x1xi32>
    %31 = arith.cmpi eq, %12, %30 : vector<8x1xi32>
    %32 = arith.ori %11, %31 : vector<8x1xi1>
    %33 = vector.broadcast %13 : vector<8x1xi32> to vector<8x128xi32>
    %34 = arith.cmpi eq, %6, %33 : vector<8x128xi32>
    %35 = arith.extui %34 : vector<8x128xi1> to vector<8x128xi32>
    %36 = arith.sitofp %35 : vector<8x128xi32> to vector<8x128xf32>
    %37 = vector.broadcast %13 : vector<8x1xi32> to vector<8x8xi32>
    %38 = arith.cmpi eq, %7, %37 : vector<8x8xi32>
    %39 = arith.extui %38 : vector<8x8xi1> to vector<8x8xi32>
    %40 = arith.sitofp %39 : vector<8x8xi32> to vector<8x8xf32>
    %cst_8 = arith.constant dense<0.000000e+00> : vector<8x128xf32>
    %41 = tpu.matmul %40, %3, %cst_8 {dimension_numbers = #tpu.dot_dimension_numbers<[1], [0], [0], [1], [0, 0, 1, 1], [], []>} : vector<8x8xf32>, vector<8x128xf32>, vector<8x128xf32> -> vector<8x128xf32>
    %c1_i32_9 = arith.constant 1 : i32
    %42 = vector.broadcast %c1_i32_9 : i32 to vector<8x1xi32>
    %43 = arith.cmpi eq, %10, %42 : vector<8x1xi32>
    %44 = vector.shape_cast %43 : vector<8x1xi1> to vector<8x1xi1>
    %45 = vector.broadcast %44 : vector<8x1xi1> to vector<8x128xi1>
    %46 = arith.select %45, %8, %9 : vector<8x128xi1>, vector<8x128xf32>
    %47 = arith.minimumf %8, %9 : vector<8x128xf32>
    %48 = arith.maximumf %8, %9 : vector<8x128xf32>
    %cst_10 = arith.constant 1.000000e+00 : f32
    %49 = vector.broadcast %cst_10 : f32 to vector<8x128xf32>
    %50 = arith.subf %49, %46 : vector<8x128xf32>
    %cst_11 = arith.constant 0.000000e+00 : f32
    %51 = vector.broadcast %cst_11 : f32 to vector<8x128xf32>
    %52 = vector.shape_cast %26 : vector<8x1xi1> to vector<8x1xi1>
    %53 = vector.broadcast %52 : vector<8x1xi1> to vector<8x128xi1>
    %54 = arith.select %53, %48, %51 : vector<8x128xi1>, vector<8x128xf32>
    %55 = vector.shape_cast %23 : vector<8x1xi1> to vector<8x1xi1>
    %56 = vector.broadcast %55 : vector<8x1xi1> to vector<8x128xi1>
    %57 = arith.select %56, %47, %54 : vector<8x128xi1>, vector<8x128xf32>
    %58 = vector.shape_cast %29 : vector<8x1xi1> to vector<8x1xi1>
    %59 = vector.broadcast %58 : vector<8x1xi1> to vector<8x128xi1>
    %60 = arith.select %59, %50, %57 : vector<8x128xi1>, vector<8x128xf32>
    %61 = vector.shape_cast %20 : vector<8x1xi1> to vector<8x1xi1>
    %62 = vector.broadcast %61 : vector<8x1xi1> to vector<8x128xi1>
    %63 = arith.select %62, %41, %60 : vector<8x128xi1>, vector<8x128xf32>
    %64 = vector.shape_cast %17 : vector<8x1xi1> to vector<8x1xi1>
    %65 = vector.broadcast %64 : vector<8x1xi1> to vector<8x128xi1>
    %66 = arith.select %65, %36, %63 : vector<8x128xi1>, vector<8x128xf32>
    %67 = arith.ori %23, %26 : vector<8x1xi1>
    %68 = arith.ori %29, %20 : vector<8x1xi1>
    %c1_i32_12 = arith.constant 1 : i32
    %69 = vector.broadcast %c1_i32_12 : i32 to vector<8x1xi32>
    %70 = arith.subi %10, %69 : vector<8x1xi32>
    %c-1_i32 = arith.constant -1 : i32
    %71 = vector.broadcast %c-1_i32 : i32 to vector<8x1xi32>
    %72 = arith.select %68, %70, %71 : vector<8x1xi1>, vector<8x1xi32>
    %c0_i32_13 = arith.constant 0 : i32
    %73 = vector.broadcast %c0_i32_13 : i32 to vector<8x1xi32>
    %74 = arith.select %67, %73, %72 : vector<8x1xi1>, vector<8x1xi32>
    %75 = arith.select %17, %10, %74 : vector<8x1xi1>, vector<8x1xi32>
    %c0_i32_14 = arith.constant 0 : i32
    %76 = vector.broadcast %c0_i32_14 : i32 to vector<8x1xi32>
    %77 = arith.cmpi eq, %75, %76 : vector<8x1xi32>
    %78 = vector.shape_cast %77 : vector<8x1xi1> to vector<8x1xi1>
    %79 = vector.broadcast %78 : vector<8x1xi1> to vector<8x128xi1>
    %80 = arith.select %79, %66, %8 : vector<8x128xi1>, vector<8x128xf32>
    %c1_i32_15 = arith.constant 1 : i32
    %81 = vector.broadcast %c1_i32_15 : i32 to vector<8x1xi32>
    %82 = arith.cmpi eq, %75, %81 : vector<8x1xi32>
    %83 = vector.shape_cast %82 : vector<8x1xi1> to vector<8x1xi1>
    %84 = vector.broadcast %83 : vector<8x1xi1> to vector<8x128xi1>
    %85 = arith.select %84, %66, %9 : vector<8x128xi1>, vector<8x128xf32>
    %86 = arith.ori %23, %26 : vector<8x1xi1>
    %c-1_i32_16 = arith.constant -1 : i32
    %c0_i32_17 = arith.constant 0 : i32
    %87 = vector.broadcast %c-1_i32_16 : i32 to vector<8x1xi32>
    %88 = vector.broadcast %c0_i32_17 : i32 to vector<8x1xi32>
    %89 = arith.select %86, %87, %88 : vector<8x1xi1>, vector<8x1xi32>
    %c1_i32_18 = arith.constant 1 : i32
    %90 = vector.broadcast %c1_i32_18 : i32 to vector<8x1xi32>
    %91 = arith.select %17, %90, %89 : vector<8x1xi1>, vector<8x1xi32>
    %92 = arith.addi %10, %91 : vector<8x1xi32>
    %93 = vector.extract_strided_slice %1 {offsets = [0, 1], sizes = [8, 1], strides = [1, 1]} : vector<8x8xi32> to vector<8x1xi32>
    %94 = vector.extract_strided_slice %2 {offsets = [0, 1], sizes = [8, 1], strides = [1, 1]} : vector<8x8xi32> to vector<8x1xi32>
    %cst_19 = arith.constant dense<true> : vector<8x1xi1>
    %95 = arith.xori %32, %cst_19 : vector<8x1xi1>
    %c0_i32_20 = arith.constant 0 : i32
    %96 = vector.broadcast %c0_i32_20 : i32 to vector<8x1xi32>
    %97 = arith.cmpi eq, %93, %96 : vector<8x1xi32>
    %98 = arith.andi %97, %95 : vector<8x1xi1>
    %c1_i32_21 = arith.constant 1 : i32
    %99 = vector.broadcast %c1_i32_21 : i32 to vector<8x1xi32>
    %100 = arith.cmpi eq, %93, %99 : vector<8x1xi32>
    %101 = arith.andi %100, %95 : vector<8x1xi1>
    %c2_i32_22 = arith.constant 2 : i32
    %102 = vector.broadcast %c2_i32_22 : i32 to vector<8x1xi32>
    %103 = arith.cmpi eq, %93, %102 : vector<8x1xi32>
    %104 = arith.andi %103, %95 : vector<8x1xi1>
    %c3_i32_23 = arith.constant 3 : i32
    %105 = vector.broadcast %c3_i32_23 : i32 to vector<8x1xi32>
    %106 = arith.cmpi eq, %93, %105 : vector<8x1xi32>
    %107 = arith.andi %106, %95 : vector<8x1xi1>
    %c4_i32_24 = arith.constant 4 : i32
    %108 = vector.broadcast %c4_i32_24 : i32 to vector<8x1xi32>
    %109 = arith.cmpi eq, %93, %108 : vector<8x1xi32>
    %110 = arith.andi %109, %95 : vector<8x1xi1>
    %c5_i32_25 = arith.constant 5 : i32
    %111 = vector.broadcast %c5_i32_25 : i32 to vector<8x1xi32>
    %112 = arith.cmpi eq, %93, %111 : vector<8x1xi32>
    %113 = arith.ori %32, %112 : vector<8x1xi1>
    %114 = vector.broadcast %94 : vector<8x1xi32> to vector<8x128xi32>
    %115 = arith.cmpi eq, %6, %114 : vector<8x128xi32>
    %116 = arith.extui %115 : vector<8x128xi1> to vector<8x128xi32>
    %117 = arith.sitofp %116 : vector<8x128xi32> to vector<8x128xf32>
    %118 = vector.broadcast %94 : vector<8x1xi32> to vector<8x8xi32>
    %119 = arith.cmpi eq, %7, %118 : vector<8x8xi32>
    %120 = arith.extui %119 : vector<8x8xi1> to vector<8x8xi32>
    %121 = arith.sitofp %120 : vector<8x8xi32> to vector<8x8xf32>
    %cst_26 = arith.constant dense<0.000000e+00> : vector<8x128xf32>
    %122 = tpu.matmul %121, %3, %cst_26 {dimension_numbers = #tpu.dot_dimension_numbers<[1], [0], [0], [1], [0, 0, 1, 1], [], []>} : vector<8x8xf32>, vector<8x128xf32>, vector<8x128xf32> -> vector<8x128xf32>
    %c1_i32_27 = arith.constant 1 : i32
    %123 = vector.broadcast %c1_i32_27 : i32 to vector<8x1xi32>
    %124 = arith.cmpi eq, %92, %123 : vector<8x1xi32>
    %125 = vector.shape_cast %124 : vector<8x1xi1> to vector<8x1xi1>
    %126 = vector.broadcast %125 : vector<8x1xi1> to vector<8x128xi1>
    %127 = arith.select %126, %80, %85 : vector<8x128xi1>, vector<8x128xf32>
    %128 = arith.minimumf %80, %85 : vector<8x128xf32>
    %129 = arith.maximumf %80, %85 : vector<8x128xf32>
    %cst_28 = arith.constant 1.000000e+00 : f32
    %130 = vector.broadcast %cst_28 : f32 to vector<8x128xf32>
    %131 = arith.subf %130, %127 : vector<8x128xf32>
    %cst_29 = arith.constant 0.000000e+00 : f32
    %132 = vector.broadcast %cst_29 : f32 to vector<8x128xf32>
    %133 = vector.shape_cast %107 : vector<8x1xi1> to vector<8x1xi1>
    %134 = vector.broadcast %133 : vector<8x1xi1> to vector<8x128xi1>
    %135 = arith.select %134, %129, %132 : vector<8x128xi1>, vector<8x128xf32>
    %136 = vector.shape_cast %104 : vector<8x1xi1> to vector<8x1xi1>
    %137 = vector.broadcast %136 : vector<8x1xi1> to vector<8x128xi1>
    %138 = arith.select %137, %128, %135 : vector<8x128xi1>, vector<8x128xf32>
    %139 = vector.shape_cast %110 : vector<8x1xi1> to vector<8x1xi1>
    %140 = vector.broadcast %139 : vector<8x1xi1> to vector<8x128xi1>
    %141 = arith.select %140, %131, %138 : vector<8x128xi1>, vector<8x128xf32>
    %142 = vector.shape_cast %101 : vector<8x1xi1> to vector<8x1xi1>
    %143 = vector.broadcast %142 : vector<8x1xi1> to vector<8x128xi1>
    %144 = arith.select %143, %122, %141 : vector<8x128xi1>, vector<8x128xf32>
    %145 = vector.shape_cast %98 : vector<8x1xi1> to vector<8x1xi1>
    %146 = vector.broadcast %145 : vector<8x1xi1> to vector<8x128xi1>
    %147 = arith.select %146, %117, %144 : vector<8x128xi1>, vector<8x128xf32>
    %148 = arith.ori %104, %107 : vector<8x1xi1>
    %149 = arith.ori %110, %101 : vector<8x1xi1>
    %c1_i32_30 = arith.constant 1 : i32
    %150 = vector.broadcast %c1_i32_30 : i32 to vector<8x1xi32>
    %151 = arith.subi %92, %150 : vector<8x1xi32>
    %c-1_i32_31 = arith.constant -1 : i32
    %152 = vector.broadcast %c-1_i32_31 : i32 to vector<8x1xi32>
    %153 = arith.select %149, %151, %152 : vector<8x1xi1>, vector<8x1xi32>
    %c0_i32_32 = arith.constant 0 : i32
    %154 = vector.broadcast %c0_i32_32 : i32 to vector<8x1xi32>
    %155 = arith.select %148, %154, %153 : vector<8x1xi1>, vector<8x1xi32>
    %156 = arith.select %98, %92, %155 : vector<8x1xi1>, vector<8x1xi32>
    %c0_i32_33 = arith.constant 0 : i32
    %157 = vector.broadcast %c0_i32_33 : i32 to vector<8x1xi32>
    %158 = arith.cmpi eq, %156, %157 : vector<8x1xi32>
    %159 = vector.shape_cast %158 : vector<8x1xi1> to vector<8x1xi1>
    %160 = vector.broadcast %159 : vector<8x1xi1> to vector<8x128xi1>
    %161 = arith.select %160, %147, %80 : vector<8x128xi1>, vector<8x128xf32>
    %c1_i32_34 = arith.constant 1 : i32
    %162 = vector.broadcast %c1_i32_34 : i32 to vector<8x1xi32>
    %163 = arith.cmpi eq, %156, %162 : vector<8x1xi32>
    %164 = vector.shape_cast %163 : vector<8x1xi1> to vector<8x1xi1>
    %165 = vector.broadcast %164 : vector<8x1xi1> to vector<8x128xi1>
    %166 = arith.select %165, %147, %85 : vector<8x128xi1>, vector<8x128xf32>
    %167 = arith.ori %104, %107 : vector<8x1xi1>
    %c-1_i32_35 = arith.constant -1 : i32
    %c0_i32_36 = arith.constant 0 : i32
    %168 = vector.broadcast %c-1_i32_35 : i32 to vector<8x1xi32>
    %169 = vector.broadcast %c0_i32_36 : i32 to vector<8x1xi32>
    %170 = arith.select %167, %168, %169 : vector<8x1xi1>, vector<8x1xi32>
    %c1_i32_37 = arith.constant 1 : i32
    %171 = vector.broadcast %c1_i32_37 : i32 to vector<8x1xi32>
    %172 = arith.select %98, %171, %170 : vector<8x1xi1>, vector<8x1xi32>
    %173 = arith.addi %92, %172 : vector<8x1xi32>
    %174 = vector.extract_strided_slice %1 {offsets = [0, 2], sizes = [8, 1], strides = [1, 1]} : vector<8x8xi32> to vector<8x1xi32>
    %175 = vector.extract_strided_slice %2 {offsets = [0, 2], sizes = [8, 1], strides = [1, 1]} : vector<8x8xi32> to vector<8x1xi32>
    %cst_38 = arith.constant dense<true> : vector<8x1xi1>
    %176 = arith.xori %113, %cst_38 : vector<8x1xi1>
    %c0_i32_39 = arith.constant 0 : i32
    %177 = vector.broadcast %c0_i32_39 : i32 to vector<8x1xi32>
    %178 = arith.cmpi eq, %174, %177 : vector<8x1xi32>
    %179 = arith.andi %178, %176 : vector<8x1xi1>
    %c1_i32_40 = arith.constant 1 : i32
    %180 = vector.broadcast %c1_i32_40 : i32 to vector<8x1xi32>
    %181 = arith.cmpi eq, %174, %180 : vector<8x1xi32>
    %182 = arith.andi %181, %176 : vector<8x1xi1>
    %c2_i32_41 = arith.constant 2 : i32
    %183 = vector.broadcast %c2_i32_41 : i32 to vector<8x1xi32>
    %184 = arith.cmpi eq, %174, %183 : vector<8x1xi32>
    %185 = arith.andi %184, %176 : vector<8x1xi1>
    %c3_i32_42 = arith.constant 3 : i32
    %186 = vector.broadcast %c3_i32_42 : i32 to vector<8x1xi32>
    %187 = arith.cmpi eq, %174, %186 : vector<8x1xi32>
    %188 = arith.andi %187, %176 : vector<8x1xi1>
    %c4_i32_43 = arith.constant 4 : i32
    %189 = vector.broadcast %c4_i32_43 : i32 to vector<8x1xi32>
    %190 = arith.cmpi eq, %174, %189 : vector<8x1xi32>
    %191 = arith.andi %190, %176 : vector<8x1xi1>
    %c5_i32_44 = arith.constant 5 : i32
    %192 = vector.broadcast %c5_i32_44 : i32 to vector<8x1xi32>
    %193 = arith.cmpi eq, %174, %192 : vector<8x1xi32>
    %194 = arith.ori %113, %193 : vector<8x1xi1>
    %195 = vector.broadcast %175 : vector<8x1xi32> to vector<8x128xi32>
    %196 = arith.cmpi eq, %6, %195 : vector<8x128xi32>
    %197 = arith.extui %196 : vector<8x128xi1> to vector<8x128xi32>
    %198 = arith.sitofp %197 : vector<8x128xi32> to vector<8x128xf32>
    %199 = vector.broadcast %175 : vector<8x1xi32> to vector<8x8xi32>
    %200 = arith.cmpi eq, %7, %199 : vector<8x8xi32>
    %201 = arith.extui %200 : vector<8x8xi1> to vector<8x8xi32>
    %202 = arith.sitofp %201 : vector<8x8xi32> to vector<8x8xf32>
    %cst_45 = arith.constant dense<0.000000e+00> : vector<8x128xf32>
    %203 = tpu.matmul %202, %3, %cst_45 {dimension_numbers = #tpu.dot_dimension_numbers<[1], [0], [0], [1], [0, 0, 1, 1], [], []>} : vector<8x8xf32>, vector<8x128xf32>, vector<8x128xf32> -> vector<8x128xf32>
    %c1_i32_46 = arith.constant 1 : i32
    %204 = vector.broadcast %c1_i32_46 : i32 to vector<8x1xi32>
    %205 = arith.cmpi eq, %173, %204 : vector<8x1xi32>
    %206 = vector.shape_cast %205 : vector<8x1xi1> to vector<8x1xi1>
    %207 = vector.broadcast %206 : vector<8x1xi1> to vector<8x128xi1>
    %208 = arith.select %207, %161, %166 : vector<8x128xi1>, vector<8x128xf32>
    %209 = arith.minimumf %161, %166 : vector<8x128xf32>
    %210 = arith.maximumf %161, %166 : vector<8x128xf32>
    %cst_47 = arith.constant 1.000000e+00 : f32
    %211 = vector.broadcast %cst_47 : f32 to vector<8x128xf32>
    %212 = arith.subf %211, %208 : vector<8x128xf32>
    %cst_48 = arith.constant 0.000000e+00 : f32
    %213 = vector.broadcast %cst_48 : f32 to vector<8x128xf32>
    %214 = vector.shape_cast %188 : vector<8x1xi1> to vector<8x1xi1>
    %215 = vector.broadcast %214 : vector<8x1xi1> to vector<8x128xi1>
    %216 = arith.select %215, %210, %213 : vector<8x128xi1>, vector<8x128xf32>
    %217 = vector.shape_cast %185 : vector<8x1xi1> to vector<8x1xi1>
    %218 = vector.broadcast %217 : vector<8x1xi1> to vector<8x128xi1>
    %219 = arith.select %218, %209, %216 : vector<8x128xi1>, vector<8x128xf32>
    %220 = vector.shape_cast %191 : vector<8x1xi1> to vector<8x1xi1>
    %221 = vector.broadcast %220 : vector<8x1xi1> to vector<8x128xi1>
    %222 = arith.select %221, %212, %219 : vector<8x128xi1>, vector<8x128xf32>
    %223 = vector.shape_cast %182 : vector<8x1xi1> to vector<8x1xi1>
    %224 = vector.broadcast %223 : vector<8x1xi1> to vector<8x128xi1>
    %225 = arith.select %224, %203, %222 : vector<8x128xi1>, vector<8x128xf32>
    %226 = vector.shape_cast %179 : vector<8x1xi1> to vector<8x1xi1>
    %227 = vector.broadcast %226 : vector<8x1xi1> to vector<8x128xi1>
    %228 = arith.select %227, %198, %225 : vector<8x128xi1>, vector<8x128xf32>
    %229 = arith.ori %185, %188 : vector<8x1xi1>
    %230 = arith.ori %191, %182 : vector<8x1xi1>
    %c1_i32_49 = arith.constant 1 : i32
    %231 = vector.broadcast %c1_i32_49 : i32 to vector<8x1xi32>
    %232 = arith.subi %173, %231 : vector<8x1xi32>
    %c-1_i32_50 = arith.constant -1 : i32
    %233 = vector.broadcast %c-1_i32_50 : i32 to vector<8x1xi32>
    %234 = arith.select %230, %232, %233 : vector<8x1xi1>, vector<8x1xi32>
    %c0_i32_51 = arith.constant 0 : i32
    %235 = vector.broadcast %c0_i32_51 : i32 to vector<8x1xi32>
    %236 = arith.select %229, %235, %234 : vector<8x1xi1>, vector<8x1xi32>
    %237 = arith.select %179, %173, %236 : vector<8x1xi1>, vector<8x1xi32>
    %c0_i32_52 = arith.constant 0 : i32
    %238 = vector.broadcast %c0_i32_52 : i32 to vector<8x1xi32>
    %239 = arith.cmpi eq, %237, %238 : vector<8x1xi32>
    %240 = vector.shape_cast %239 : vector<8x1xi1> to vector<8x1xi1>
    %241 = vector.broadcast %240 : vector<8x1xi1> to vector<8x128xi1>
    %242 = arith.select %241, %228, %161 : vector<8x128xi1>, vector<8x128xf32>
    %c1_i32_53 = arith.constant 1 : i32
    %243 = vector.broadcast %c1_i32_53 : i32 to vector<8x1xi32>
    %244 = arith.cmpi eq, %237, %243 : vector<8x1xi32>
    %245 = vector.shape_cast %244 : vector<8x1xi1> to vector<8x1xi1>
    %246 = vector.broadcast %245 : vector<8x1xi1> to vector<8x128xi1>
    %247 = arith.select %246, %228, %166 : vector<8x128xi1>, vector<8x128xf32>
    %248 = arith.ori %185, %188 : vector<8x1xi1>
    %c-1_i32_54 = arith.constant -1 : i32
    %c0_i32_55 = arith.constant 0 : i32
    %249 = vector.broadcast %c-1_i32_54 : i32 to vector<8x1xi32>
    %250 = vector.broadcast %c0_i32_55 : i32 to vector<8x1xi32>
    %251 = arith.select %248, %249, %250 : vector<8x1xi1>, vector<8x1xi32>
    %c1_i32_56 = arith.constant 1 : i32
    %252 = vector.broadcast %c1_i32_56 : i32 to vector<8x1xi32>
    %253 = arith.select %179, %252, %251 : vector<8x1xi1>, vector<8x1xi32>
    %254 = arith.addi %173, %253 : vector<8x1xi32>
    %255 = vector.extract_strided_slice %1 {offsets = [0, 3], sizes = [8, 1], strides = [1, 1]} : vector<8x8xi32> to vector<8x1xi32>
    %256 = vector.extract_strided_slice %2 {offsets = [0, 3], sizes = [8, 1], strides = [1, 1]} : vector<8x8xi32> to vector<8x1xi32>
    %cst_57 = arith.constant dense<true> : vector<8x1xi1>
    %257 = arith.xori %194, %cst_57 : vector<8x1xi1>
    %c0_i32_58 = arith.constant 0 : i32
    %258 = vector.broadcast %c0_i32_58 : i32 to vector<8x1xi32>
    %259 = arith.cmpi eq, %255, %258 : vector<8x1xi32>
    %260 = arith.andi %259, %257 : vector<8x1xi1>
    %c1_i32_59 = arith.constant 1 : i32
    %261 = vector.broadcast %c1_i32_59 : i32 to vector<8x1xi32>
    %262 = arith.cmpi eq, %255, %261 : vector<8x1xi32>
    %263 = arith.andi %262, %257 : vector<8x1xi1>
    %c2_i32_60 = arith.constant 2 : i32
    %264 = vector.broadcast %c2_i32_60 : i32 to vector<8x1xi32>
    %265 = arith.cmpi eq, %255, %264 : vector<8x1xi32>
    %266 = arith.andi %265, %257 : vector<8x1xi1>
    %c3_i32_61 = arith.constant 3 : i32
    %267 = vector.broadcast %c3_i32_61 : i32 to vector<8x1xi32>
    %268 = arith.cmpi eq, %255, %267 : vector<8x1xi32>
    %269 = arith.andi %268, %257 : vector<8x1xi1>
    %c4_i32_62 = arith.constant 4 : i32
    %270 = vector.broadcast %c4_i32_62 : i32 to vector<8x1xi32>
    %271 = arith.cmpi eq, %255, %270 : vector<8x1xi32>
    %272 = arith.andi %271, %257 : vector<8x1xi1>
    %c5_i32_63 = arith.constant 5 : i32
    %273 = vector.broadcast %c5_i32_63 : i32 to vector<8x1xi32>
    %274 = arith.cmpi eq, %255, %273 : vector<8x1xi32>
    %275 = arith.ori %194, %274 : vector<8x1xi1>
    %276 = vector.broadcast %256 : vector<8x1xi32> to vector<8x128xi32>
    %277 = arith.cmpi eq, %6, %276 : vector<8x128xi32>
    %278 = arith.extui %277 : vector<8x128xi1> to vector<8x128xi32>
    %279 = arith.sitofp %278 : vector<8x128xi32> to vector<8x128xf32>
    %280 = vector.broadcast %256 : vector<8x1xi32> to vector<8x8xi32>
    %281 = arith.cmpi eq, %7, %280 : vector<8x8xi32>
    %282 = arith.extui %281 : vector<8x8xi1> to vector<8x8xi32>
    %283 = arith.sitofp %282 : vector<8x8xi32> to vector<8x8xf32>
    %cst_64 = arith.constant dense<0.000000e+00> : vector<8x128xf32>
    %284 = tpu.matmul %283, %3, %cst_64 {dimension_numbers = #tpu.dot_dimension_numbers<[1], [0], [0], [1], [0, 0, 1, 1], [], []>} : vector<8x8xf32>, vector<8x128xf32>, vector<8x128xf32> -> vector<8x128xf32>
    %c1_i32_65 = arith.constant 1 : i32
    %285 = vector.broadcast %c1_i32_65 : i32 to vector<8x1xi32>
    %286 = arith.cmpi eq, %254, %285 : vector<8x1xi32>
    %287 = vector.shape_cast %286 : vector<8x1xi1> to vector<8x1xi1>
    %288 = vector.broadcast %287 : vector<8x1xi1> to vector<8x128xi1>
    %289 = arith.select %288, %242, %247 : vector<8x128xi1>, vector<8x128xf32>
    %290 = arith.minimumf %242, %247 : vector<8x128xf32>
    %291 = arith.maximumf %242, %247 : vector<8x128xf32>
    %cst_66 = arith.constant 1.000000e+00 : f32
    %292 = vector.broadcast %cst_66 : f32 to vector<8x128xf32>
    %293 = arith.subf %292, %289 : vector<8x128xf32>
    %cst_67 = arith.constant 0.000000e+00 : f32
    %294 = vector.broadcast %cst_67 : f32 to vector<8x128xf32>
    %295 = vector.shape_cast %269 : vector<8x1xi1> to vector<8x1xi1>
    %296 = vector.broadcast %295 : vector<8x1xi1> to vector<8x128xi1>
    %297 = arith.select %296, %291, %294 : vector<8x128xi1>, vector<8x128xf32>
    %298 = vector.shape_cast %266 : vector<8x1xi1> to vector<8x1xi1>
    %299 = vector.broadcast %298 : vector<8x1xi1> to vector<8x128xi1>
    %300 = arith.select %299, %290, %297 : vector<8x128xi1>, vector<8x128xf32>
    %301 = vector.shape_cast %272 : vector<8x1xi1> to vector<8x1xi1>
    %302 = vector.broadcast %301 : vector<8x1xi1> to vector<8x128xi1>
    %303 = arith.select %302, %293, %300 : vector<8x128xi1>, vector<8x128xf32>
    %304 = vector.shape_cast %263 : vector<8x1xi1> to vector<8x1xi1>
    %305 = vector.broadcast %304 : vector<8x1xi1> to vector<8x128xi1>
    %306 = arith.select %305, %284, %303 : vector<8x128xi1>, vector<8x128xf32>
    %307 = vector.shape_cast %260 : vector<8x1xi1> to vector<8x1xi1>
    %308 = vector.broadcast %307 : vector<8x1xi1> to vector<8x128xi1>
    %309 = arith.select %308, %279, %306 : vector<8x128xi1>, vector<8x128xf32>
    %310 = arith.ori %266, %269 : vector<8x1xi1>
    %311 = arith.ori %272, %263 : vector<8x1xi1>
    %c1_i32_68 = arith.constant 1 : i32
    %312 = vector.broadcast %c1_i32_68 : i32 to vector<8x1xi32>
    %313 = arith.subi %254, %312 : vector<8x1xi32>
    %c-1_i32_69 = arith.constant -1 : i32
    %314 = vector.broadcast %c-1_i32_69 : i32 to vector<8x1xi32>
    %315 = arith.select %311, %313, %314 : vector<8x1xi1>, vector<8x1xi32>
    %c0_i32_70 = arith.constant 0 : i32
    %316 = vector.broadcast %c0_i32_70 : i32 to vector<8x1xi32>
    %317 = arith.select %310, %316, %315 : vector<8x1xi1>, vector<8x1xi32>
    %318 = arith.select %260, %254, %317 : vector<8x1xi1>, vector<8x1xi32>
    %c0_i32_71 = arith.constant 0 : i32
    %319 = vector.broadcast %c0_i32_71 : i32 to vector<8x1xi32>
    %320 = arith.cmpi eq, %318, %319 : vector<8x1xi32>
    %321 = vector.shape_cast %320 : vector<8x1xi1> to vector<8x1xi1>
    %322 = vector.broadcast %321 : vector<8x1xi1> to vector<8x128xi1>
    %323 = arith.select %322, %309, %242 : vector<8x128xi1>, vector<8x128xf32>
    %c1_i32_72 = arith.constant 1 : i32
    %324 = vector.broadcast %c1_i32_72 : i32 to vector<8x1xi32>
    %325 = arith.cmpi eq, %318, %324 : vector<8x1xi32>
    %326 = vector.shape_cast %325 : vector<8x1xi1> to vector<8x1xi1>
    %327 = vector.broadcast %326 : vector<8x1xi1> to vector<8x128xi1>
    %328 = arith.select %327, %309, %247 : vector<8x128xi1>, vector<8x128xf32>
    %329 = arith.ori %266, %269 : vector<8x1xi1>
    %c-1_i32_73 = arith.constant -1 : i32
    %c0_i32_74 = arith.constant 0 : i32
    %330 = vector.broadcast %c-1_i32_73 : i32 to vector<8x1xi32>
    %331 = vector.broadcast %c0_i32_74 : i32 to vector<8x1xi32>
    %332 = arith.select %329, %330, %331 : vector<8x1xi1>, vector<8x1xi32>
    %c1_i32_75 = arith.constant 1 : i32
    %333 = vector.broadcast %c1_i32_75 : i32 to vector<8x1xi32>
    %334 = arith.select %260, %333, %332 : vector<8x1xi1>, vector<8x1xi32>
    %335 = arith.addi %254, %334 : vector<8x1xi32>
    %336 = vector.extract_strided_slice %1 {offsets = [0, 4], sizes = [8, 1], strides = [1, 1]} : vector<8x8xi32> to vector<8x1xi32>
    %337 = vector.extract_strided_slice %2 {offsets = [0, 4], sizes = [8, 1], strides = [1, 1]} : vector<8x8xi32> to vector<8x1xi32>
    %cst_76 = arith.constant dense<true> : vector<8x1xi1>
    %338 = arith.xori %275, %cst_76 : vector<8x1xi1>
    %c0_i32_77 = arith.constant 0 : i32
    %339 = vector.broadcast %c0_i32_77 : i32 to vector<8x1xi32>
    %340 = arith.cmpi eq, %336, %339 : vector<8x1xi32>
    %341 = arith.andi %340, %338 : vector<8x1xi1>
    %c1_i32_78 = arith.constant 1 : i32
    %342 = vector.broadcast %c1_i32_78 : i32 to vector<8x1xi32>
    %343 = arith.cmpi eq, %336, %342 : vector<8x1xi32>
    %344 = arith.andi %343, %338 : vector<8x1xi1>
    %c2_i32_79 = arith.constant 2 : i32
    %345 = vector.broadcast %c2_i32_79 : i32 to vector<8x1xi32>
    %346 = arith.cmpi eq, %336, %345 : vector<8x1xi32>
    %347 = arith.andi %346, %338 : vector<8x1xi1>
    %c3_i32_80 = arith.constant 3 : i32
    %348 = vector.broadcast %c3_i32_80 : i32 to vector<8x1xi32>
    %349 = arith.cmpi eq, %336, %348 : vector<8x1xi32>
    %350 = arith.andi %349, %338 : vector<8x1xi1>
    %c4_i32_81 = arith.constant 4 : i32
    %351 = vector.broadcast %c4_i32_81 : i32 to vector<8x1xi32>
    %352 = arith.cmpi eq, %336, %351 : vector<8x1xi32>
    %353 = arith.andi %352, %338 : vector<8x1xi1>
    %c5_i32_82 = arith.constant 5 : i32
    %354 = vector.broadcast %c5_i32_82 : i32 to vector<8x1xi32>
    %355 = arith.cmpi eq, %336, %354 : vector<8x1xi32>
    %356 = arith.ori %275, %355 : vector<8x1xi1>
    %357 = vector.broadcast %337 : vector<8x1xi32> to vector<8x128xi32>
    %358 = arith.cmpi eq, %6, %357 : vector<8x128xi32>
    %359 = arith.extui %358 : vector<8x128xi1> to vector<8x128xi32>
    %360 = arith.sitofp %359 : vector<8x128xi32> to vector<8x128xf32>
    %361 = vector.broadcast %337 : vector<8x1xi32> to vector<8x8xi32>
    %362 = arith.cmpi eq, %7, %361 : vector<8x8xi32>
    %363 = arith.extui %362 : vector<8x8xi1> to vector<8x8xi32>
    %364 = arith.sitofp %363 : vector<8x8xi32> to vector<8x8xf32>
    %cst_83 = arith.constant dense<0.000000e+00> : vector<8x128xf32>
    %365 = tpu.matmul %364, %3, %cst_83 {dimension_numbers = #tpu.dot_dimension_numbers<[1], [0], [0], [1], [0, 0, 1, 1], [], []>} : vector<8x8xf32>, vector<8x128xf32>, vector<8x128xf32> -> vector<8x128xf32>
    %c1_i32_84 = arith.constant 1 : i32
    %366 = vector.broadcast %c1_i32_84 : i32 to vector<8x1xi32>
    %367 = arith.cmpi eq, %335, %366 : vector<8x1xi32>
    %368 = vector.shape_cast %367 : vector<8x1xi1> to vector<8x1xi1>
    %369 = vector.broadcast %368 : vector<8x1xi1> to vector<8x128xi1>
    %370 = arith.select %369, %323, %328 : vector<8x128xi1>, vector<8x128xf32>
    %371 = arith.minimumf %323, %328 : vector<8x128xf32>
    %372 = arith.maximumf %323, %328 : vector<8x128xf32>
    %cst_85 = arith.constant 1.000000e+00 : f32
    %373 = vector.broadcast %cst_85 : f32 to vector<8x128xf32>
    %374 = arith.subf %373, %370 : vector<8x128xf32>
    %cst_86 = arith.constant 0.000000e+00 : f32
    %375 = vector.broadcast %cst_86 : f32 to vector<8x128xf32>
    %376 = vector.shape_cast %350 : vector<8x1xi1> to vector<8x1xi1>
    %377 = vector.broadcast %376 : vector<8x1xi1> to vector<8x128xi1>
    %378 = arith.select %377, %372, %375 : vector<8x128xi1>, vector<8x128xf32>
    %379 = vector.shape_cast %347 : vector<8x1xi1> to vector<8x1xi1>
    %380 = vector.broadcast %379 : vector<8x1xi1> to vector<8x128xi1>
    %381 = arith.select %380, %371, %378 : vector<8x128xi1>, vector<8x128xf32>
    %382 = vector.shape_cast %353 : vector<8x1xi1> to vector<8x1xi1>
    %383 = vector.broadcast %382 : vector<8x1xi1> to vector<8x128xi1>
    %384 = arith.select %383, %374, %381 : vector<8x128xi1>, vector<8x128xf32>
    %385 = vector.shape_cast %344 : vector<8x1xi1> to vector<8x1xi1>
    %386 = vector.broadcast %385 : vector<8x1xi1> to vector<8x128xi1>
    %387 = arith.select %386, %365, %384 : vector<8x128xi1>, vector<8x128xf32>
    %388 = vector.shape_cast %341 : vector<8x1xi1> to vector<8x1xi1>
    %389 = vector.broadcast %388 : vector<8x1xi1> to vector<8x128xi1>
    %390 = arith.select %389, %360, %387 : vector<8x128xi1>, vector<8x128xf32>
    %391 = arith.ori %347, %350 : vector<8x1xi1>
    %392 = arith.ori %353, %344 : vector<8x1xi1>
    %c1_i32_87 = arith.constant 1 : i32
    %393 = vector.broadcast %c1_i32_87 : i32 to vector<8x1xi32>
    %394 = arith.subi %335, %393 : vector<8x1xi32>
    %c-1_i32_88 = arith.constant -1 : i32
    %395 = vector.broadcast %c-1_i32_88 : i32 to vector<8x1xi32>
    %396 = arith.select %392, %394, %395 : vector<8x1xi1>, vector<8x1xi32>
    %c0_i32_89 = arith.constant 0 : i32
    %397 = vector.broadcast %c0_i32_89 : i32 to vector<8x1xi32>
    %398 = arith.select %391, %397, %396 : vector<8x1xi1>, vector<8x1xi32>
    %399 = arith.select %341, %335, %398 : vector<8x1xi1>, vector<8x1xi32>
    %c0_i32_90 = arith.constant 0 : i32
    %400 = vector.broadcast %c0_i32_90 : i32 to vector<8x1xi32>
    %401 = arith.cmpi eq, %399, %400 : vector<8x1xi32>
    %402 = vector.shape_cast %401 : vector<8x1xi1> to vector<8x1xi1>
    %403 = vector.broadcast %402 : vector<8x1xi1> to vector<8x128xi1>
    %404 = arith.select %403, %390, %323 : vector<8x128xi1>, vector<8x128xf32>
    %c1_i32_91 = arith.constant 1 : i32
    %405 = vector.broadcast %c1_i32_91 : i32 to vector<8x1xi32>
    %406 = arith.cmpi eq, %399, %405 : vector<8x1xi32>
    %407 = vector.shape_cast %406 : vector<8x1xi1> to vector<8x1xi1>
    %408 = vector.broadcast %407 : vector<8x1xi1> to vector<8x128xi1>
    %409 = arith.select %408, %390, %328 : vector<8x128xi1>, vector<8x128xf32>
    %410 = arith.ori %347, %350 : vector<8x1xi1>
    %c-1_i32_92 = arith.constant -1 : i32
    %c0_i32_93 = arith.constant 0 : i32
    %411 = vector.broadcast %c-1_i32_92 : i32 to vector<8x1xi32>
    %412 = vector.broadcast %c0_i32_93 : i32 to vector<8x1xi32>
    %413 = arith.select %410, %411, %412 : vector<8x1xi1>, vector<8x1xi32>
    %c1_i32_94 = arith.constant 1 : i32
    %414 = vector.broadcast %c1_i32_94 : i32 to vector<8x1xi32>
    %415 = arith.select %341, %414, %413 : vector<8x1xi1>, vector<8x1xi32>
    %416 = arith.addi %335, %415 : vector<8x1xi32>
    %417 = vector.extract_strided_slice %1 {offsets = [0, 5], sizes = [8, 1], strides = [1, 1]} : vector<8x8xi32> to vector<8x1xi32>
    %418 = vector.extract_strided_slice %2 {offsets = [0, 5], sizes = [8, 1], strides = [1, 1]} : vector<8x8xi32> to vector<8x1xi32>
    %cst_95 = arith.constant dense<true> : vector<8x1xi1>
    %419 = arith.xori %356, %cst_95 : vector<8x1xi1>
    %c0_i32_96 = arith.constant 0 : i32
    %420 = vector.broadcast %c0_i32_96 : i32 to vector<8x1xi32>
    %421 = arith.cmpi eq, %417, %420 : vector<8x1xi32>
    %422 = arith.andi %421, %419 : vector<8x1xi1>
    %c1_i32_97 = arith.constant 1 : i32
    %423 = vector.broadcast %c1_i32_97 : i32 to vector<8x1xi32>
    %424 = arith.cmpi eq, %417, %423 : vector<8x1xi32>
    %425 = arith.andi %424, %419 : vector<8x1xi1>
    %c2_i32_98 = arith.constant 2 : i32
    %426 = vector.broadcast %c2_i32_98 : i32 to vector<8x1xi32>
    %427 = arith.cmpi eq, %417, %426 : vector<8x1xi32>
    %428 = arith.andi %427, %419 : vector<8x1xi1>
    %c3_i32_99 = arith.constant 3 : i32
    %429 = vector.broadcast %c3_i32_99 : i32 to vector<8x1xi32>
    %430 = arith.cmpi eq, %417, %429 : vector<8x1xi32>
    %431 = arith.andi %430, %419 : vector<8x1xi1>
    %c4_i32_100 = arith.constant 4 : i32
    %432 = vector.broadcast %c4_i32_100 : i32 to vector<8x1xi32>
    %433 = arith.cmpi eq, %417, %432 : vector<8x1xi32>
    %434 = arith.andi %433, %419 : vector<8x1xi1>
    %c5_i32_101 = arith.constant 5 : i32
    %435 = vector.broadcast %c5_i32_101 : i32 to vector<8x1xi32>
    %436 = arith.cmpi eq, %417, %435 : vector<8x1xi32>
    %437 = arith.ori %356, %436 : vector<8x1xi1>
    %438 = vector.broadcast %418 : vector<8x1xi32> to vector<8x128xi32>
    %439 = arith.cmpi eq, %6, %438 : vector<8x128xi32>
    %440 = arith.extui %439 : vector<8x128xi1> to vector<8x128xi32>
    %441 = arith.sitofp %440 : vector<8x128xi32> to vector<8x128xf32>
    %442 = vector.broadcast %418 : vector<8x1xi32> to vector<8x8xi32>
    %443 = arith.cmpi eq, %7, %442 : vector<8x8xi32>
    %444 = arith.extui %443 : vector<8x8xi1> to vector<8x8xi32>
    %445 = arith.sitofp %444 : vector<8x8xi32> to vector<8x8xf32>
    %cst_102 = arith.constant dense<0.000000e+00> : vector<8x128xf32>
    %446 = tpu.matmul %445, %3, %cst_102 {dimension_numbers = #tpu.dot_dimension_numbers<[1], [0], [0], [1], [0, 0, 1, 1], [], []>} : vector<8x8xf32>, vector<8x128xf32>, vector<8x128xf32> -> vector<8x128xf32>
    %c1_i32_103 = arith.constant 1 : i32
    %447 = vector.broadcast %c1_i32_103 : i32 to vector<8x1xi32>
    %448 = arith.cmpi eq, %416, %447 : vector<8x1xi32>
    %449 = vector.shape_cast %448 : vector<8x1xi1> to vector<8x1xi1>
    %450 = vector.broadcast %449 : vector<8x1xi1> to vector<8x128xi1>
    %451 = arith.select %450, %404, %409 : vector<8x128xi1>, vector<8x128xf32>
    %452 = arith.minimumf %404, %409 : vector<8x128xf32>
    %453 = arith.maximumf %404, %409 : vector<8x128xf32>
    %cst_104 = arith.constant 1.000000e+00 : f32
    %454 = vector.broadcast %cst_104 : f32 to vector<8x128xf32>
    %455 = arith.subf %454, %451 : vector<8x128xf32>
    %cst_105 = arith.constant 0.000000e+00 : f32
    %456 = vector.broadcast %cst_105 : f32 to vector<8x128xf32>
    %457 = vector.shape_cast %431 : vector<8x1xi1> to vector<8x1xi1>
    %458 = vector.broadcast %457 : vector<8x1xi1> to vector<8x128xi1>
    %459 = arith.select %458, %453, %456 : vector<8x128xi1>, vector<8x128xf32>
    %460 = vector.shape_cast %428 : vector<8x1xi1> to vector<8x1xi1>
    %461 = vector.broadcast %460 : vector<8x1xi1> to vector<8x128xi1>
    %462 = arith.select %461, %452, %459 : vector<8x128xi1>, vector<8x128xf32>
    %463 = vector.shape_cast %434 : vector<8x1xi1> to vector<8x1xi1>
    %464 = vector.broadcast %463 : vector<8x1xi1> to vector<8x128xi1>
    %465 = arith.select %464, %455, %462 : vector<8x128xi1>, vector<8x128xf32>
    %466 = vector.shape_cast %425 : vector<8x1xi1> to vector<8x1xi1>
    %467 = vector.broadcast %466 : vector<8x1xi1> to vector<8x128xi1>
    %468 = arith.select %467, %446, %465 : vector<8x128xi1>, vector<8x128xf32>
    %469 = vector.shape_cast %422 : vector<8x1xi1> to vector<8x1xi1>
    %470 = vector.broadcast %469 : vector<8x1xi1> to vector<8x128xi1>
    %471 = arith.select %470, %441, %468 : vector<8x128xi1>, vector<8x128xf32>
    %472 = arith.ori %428, %431 : vector<8x1xi1>
    %473 = arith.ori %434, %425 : vector<8x1xi1>
    %c1_i32_106 = arith.constant 1 : i32
    %474 = vector.broadcast %c1_i32_106 : i32 to vector<8x1xi32>
    %475 = arith.subi %416, %474 : vector<8x1xi32>
    %c-1_i32_107 = arith.constant -1 : i32
    %476 = vector.broadcast %c-1_i32_107 : i32 to vector<8x1xi32>
    %477 = arith.select %473, %475, %476 : vector<8x1xi1>, vector<8x1xi32>
    %c0_i32_108 = arith.constant 0 : i32
    %478 = vector.broadcast %c0_i32_108 : i32 to vector<8x1xi32>
    %479 = arith.select %472, %478, %477 : vector<8x1xi1>, vector<8x1xi32>
    %480 = arith.select %422, %416, %479 : vector<8x1xi1>, vector<8x1xi32>
    %c0_i32_109 = arith.constant 0 : i32
    %481 = vector.broadcast %c0_i32_109 : i32 to vector<8x1xi32>
    %482 = arith.cmpi eq, %480, %481 : vector<8x1xi32>
    %483 = vector.shape_cast %482 : vector<8x1xi1> to vector<8x1xi1>
    %484 = vector.broadcast %483 : vector<8x1xi1> to vector<8x128xi1>
    %485 = arith.select %484, %471, %404 : vector<8x128xi1>, vector<8x128xf32>
    %c1_i32_110 = arith.constant 1 : i32
    %486 = vector.broadcast %c1_i32_110 : i32 to vector<8x1xi32>
    %487 = arith.cmpi eq, %480, %486 : vector<8x1xi32>
    %488 = vector.shape_cast %487 : vector<8x1xi1> to vector<8x1xi1>
    %489 = vector.broadcast %488 : vector<8x1xi1> to vector<8x128xi1>
    %490 = arith.select %489, %471, %409 : vector<8x128xi1>, vector<8x128xf32>
    %491 = arith.ori %428, %431 : vector<8x1xi1>
    %c-1_i32_111 = arith.constant -1 : i32
    %c0_i32_112 = arith.constant 0 : i32
    %492 = vector.broadcast %c-1_i32_111 : i32 to vector<8x1xi32>
    %493 = vector.broadcast %c0_i32_112 : i32 to vector<8x1xi32>
    %494 = arith.select %491, %492, %493 : vector<8x1xi1>, vector<8x1xi32>
    %c1_i32_113 = arith.constant 1 : i32
    %495 = vector.broadcast %c1_i32_113 : i32 to vector<8x1xi32>
    %496 = arith.select %422, %495, %494 : vector<8x1xi1>, vector<8x1xi32>
    %497 = arith.addi %416, %496 : vector<8x1xi32>
    %498 = vector.extract_strided_slice %1 {offsets = [0, 6], sizes = [8, 1], strides = [1, 1]} : vector<8x8xi32> to vector<8x1xi32>
    %499 = vector.extract_strided_slice %2 {offsets = [0, 6], sizes = [8, 1], strides = [1, 1]} : vector<8x8xi32> to vector<8x1xi32>
    %cst_114 = arith.constant dense<true> : vector<8x1xi1>
    %500 = arith.xori %437, %cst_114 : vector<8x1xi1>
    %c0_i32_115 = arith.constant 0 : i32
    %501 = vector.broadcast %c0_i32_115 : i32 to vector<8x1xi32>
    %502 = arith.cmpi eq, %498, %501 : vector<8x1xi32>
    %503 = arith.andi %502, %500 : vector<8x1xi1>
    %c1_i32_116 = arith.constant 1 : i32
    %504 = vector.broadcast %c1_i32_116 : i32 to vector<8x1xi32>
    %505 = arith.cmpi eq, %498, %504 : vector<8x1xi32>
    %506 = arith.andi %505, %500 : vector<8x1xi1>
    %c2_i32_117 = arith.constant 2 : i32
    %507 = vector.broadcast %c2_i32_117 : i32 to vector<8x1xi32>
    %508 = arith.cmpi eq, %498, %507 : vector<8x1xi32>
    %509 = arith.andi %508, %500 : vector<8x1xi1>
    %c3_i32_118 = arith.constant 3 : i32
    %510 = vector.broadcast %c3_i32_118 : i32 to vector<8x1xi32>
    %511 = arith.cmpi eq, %498, %510 : vector<8x1xi32>
    %512 = arith.andi %511, %500 : vector<8x1xi1>
    %c4_i32_119 = arith.constant 4 : i32
    %513 = vector.broadcast %c4_i32_119 : i32 to vector<8x1xi32>
    %514 = arith.cmpi eq, %498, %513 : vector<8x1xi32>
    %515 = arith.andi %514, %500 : vector<8x1xi1>
    %c5_i32_120 = arith.constant 5 : i32
    %516 = vector.broadcast %c5_i32_120 : i32 to vector<8x1xi32>
    %517 = arith.cmpi eq, %498, %516 : vector<8x1xi32>
    %518 = arith.ori %437, %517 : vector<8x1xi1>
    %519 = vector.broadcast %499 : vector<8x1xi32> to vector<8x128xi32>
    %520 = arith.cmpi eq, %6, %519 : vector<8x128xi32>
    %521 = arith.extui %520 : vector<8x128xi1> to vector<8x128xi32>
    %522 = arith.sitofp %521 : vector<8x128xi32> to vector<8x128xf32>
    %523 = vector.broadcast %499 : vector<8x1xi32> to vector<8x8xi32>
    %524 = arith.cmpi eq, %7, %523 : vector<8x8xi32>
    %525 = arith.extui %524 : vector<8x8xi1> to vector<8x8xi32>
    %526 = arith.sitofp %525 : vector<8x8xi32> to vector<8x8xf32>
    %cst_121 = arith.constant dense<0.000000e+00> : vector<8x128xf32>
    %527 = tpu.matmul %526, %3, %cst_121 {dimension_numbers = #tpu.dot_dimension_numbers<[1], [0], [0], [1], [0, 0, 1, 1], [], []>} : vector<8x8xf32>, vector<8x128xf32>, vector<8x128xf32> -> vector<8x128xf32>
    %c1_i32_122 = arith.constant 1 : i32
    %528 = vector.broadcast %c1_i32_122 : i32 to vector<8x1xi32>
    %529 = arith.cmpi eq, %497, %528 : vector<8x1xi32>
    %530 = vector.shape_cast %529 : vector<8x1xi1> to vector<8x1xi1>
    %531 = vector.broadcast %530 : vector<8x1xi1> to vector<8x128xi1>
    %532 = arith.select %531, %485, %490 : vector<8x128xi1>, vector<8x128xf32>
    %533 = arith.minimumf %485, %490 : vector<8x128xf32>
    %534 = arith.maximumf %485, %490 : vector<8x128xf32>
    %cst_123 = arith.constant 1.000000e+00 : f32
    %535 = vector.broadcast %cst_123 : f32 to vector<8x128xf32>
    %536 = arith.subf %535, %532 : vector<8x128xf32>
    %cst_124 = arith.constant 0.000000e+00 : f32
    %537 = vector.broadcast %cst_124 : f32 to vector<8x128xf32>
    %538 = vector.shape_cast %512 : vector<8x1xi1> to vector<8x1xi1>
    %539 = vector.broadcast %538 : vector<8x1xi1> to vector<8x128xi1>
    %540 = arith.select %539, %534, %537 : vector<8x128xi1>, vector<8x128xf32>
    %541 = vector.shape_cast %509 : vector<8x1xi1> to vector<8x1xi1>
    %542 = vector.broadcast %541 : vector<8x1xi1> to vector<8x128xi1>
    %543 = arith.select %542, %533, %540 : vector<8x128xi1>, vector<8x128xf32>
    %544 = vector.shape_cast %515 : vector<8x1xi1> to vector<8x1xi1>
    %545 = vector.broadcast %544 : vector<8x1xi1> to vector<8x128xi1>
    %546 = arith.select %545, %536, %543 : vector<8x128xi1>, vector<8x128xf32>
    %547 = vector.shape_cast %506 : vector<8x1xi1> to vector<8x1xi1>
    %548 = vector.broadcast %547 : vector<8x1xi1> to vector<8x128xi1>
    %549 = arith.select %548, %527, %546 : vector<8x128xi1>, vector<8x128xf32>
    %550 = vector.shape_cast %503 : vector<8x1xi1> to vector<8x1xi1>
    %551 = vector.broadcast %550 : vector<8x1xi1> to vector<8x128xi1>
    %552 = arith.select %551, %522, %549 : vector<8x128xi1>, vector<8x128xf32>
    %553 = arith.ori %509, %512 : vector<8x1xi1>
    %554 = arith.ori %515, %506 : vector<8x1xi1>
    %c1_i32_125 = arith.constant 1 : i32
    %555 = vector.broadcast %c1_i32_125 : i32 to vector<8x1xi32>
    %556 = arith.subi %497, %555 : vector<8x1xi32>
    %c-1_i32_126 = arith.constant -1 : i32
    %557 = vector.broadcast %c-1_i32_126 : i32 to vector<8x1xi32>
    %558 = arith.select %554, %556, %557 : vector<8x1xi1>, vector<8x1xi32>
    %c0_i32_127 = arith.constant 0 : i32
    %559 = vector.broadcast %c0_i32_127 : i32 to vector<8x1xi32>
    %560 = arith.select %553, %559, %558 : vector<8x1xi1>, vector<8x1xi32>
    %561 = arith.select %503, %497, %560 : vector<8x1xi1>, vector<8x1xi32>
    %c0_i32_128 = arith.constant 0 : i32
    %562 = vector.broadcast %c0_i32_128 : i32 to vector<8x1xi32>
    %563 = arith.cmpi eq, %561, %562 : vector<8x1xi32>
    %564 = vector.shape_cast %563 : vector<8x1xi1> to vector<8x1xi1>
    %565 = vector.broadcast %564 : vector<8x1xi1> to vector<8x128xi1>
    %566 = arith.select %565, %552, %485 : vector<8x128xi1>, vector<8x128xf32>
    %c1_i32_129 = arith.constant 1 : i32
    %567 = vector.broadcast %c1_i32_129 : i32 to vector<8x1xi32>
    %568 = arith.cmpi eq, %561, %567 : vector<8x1xi32>
    %569 = vector.shape_cast %568 : vector<8x1xi1> to vector<8x1xi1>
    %570 = vector.broadcast %569 : vector<8x1xi1> to vector<8x128xi1>
    %571 = arith.select %570, %552, %490 : vector<8x128xi1>, vector<8x128xf32>
    %572 = arith.ori %509, %512 : vector<8x1xi1>
    %c-1_i32_130 = arith.constant -1 : i32
    %c0_i32_131 = arith.constant 0 : i32
    %573 = vector.broadcast %c-1_i32_130 : i32 to vector<8x1xi32>
    %574 = vector.broadcast %c0_i32_131 : i32 to vector<8x1xi32>
    %575 = arith.select %572, %573, %574 : vector<8x1xi1>, vector<8x1xi32>
    %c1_i32_132 = arith.constant 1 : i32
    %576 = vector.broadcast %c1_i32_132 : i32 to vector<8x1xi32>
    %577 = arith.select %503, %576, %575 : vector<8x1xi1>, vector<8x1xi32>
    %578 = arith.addi %497, %577 : vector<8x1xi32>
    %579 = vector.extract_strided_slice %1 {offsets = [0, 7], sizes = [8, 1], strides = [1, 1]} : vector<8x8xi32> to vector<8x1xi32>
    %580 = vector.extract_strided_slice %2 {offsets = [0, 7], sizes = [8, 1], strides = [1, 1]} : vector<8x8xi32> to vector<8x1xi32>
    %cst_133 = arith.constant dense<true> : vector<8x1xi1>
    %581 = arith.xori %518, %cst_133 : vector<8x1xi1>
    %c0_i32_134 = arith.constant 0 : i32
    %582 = vector.broadcast %c0_i32_134 : i32 to vector<8x1xi32>
    %583 = arith.cmpi eq, %579, %582 : vector<8x1xi32>
    %584 = arith.andi %583, %581 : vector<8x1xi1>
    %c1_i32_135 = arith.constant 1 : i32
    %585 = vector.broadcast %c1_i32_135 : i32 to vector<8x1xi32>
    %586 = arith.cmpi eq, %579, %585 : vector<8x1xi32>
    %587 = arith.andi %586, %581 : vector<8x1xi1>
    %c2_i32_136 = arith.constant 2 : i32
    %588 = vector.broadcast %c2_i32_136 : i32 to vector<8x1xi32>
    %589 = arith.cmpi eq, %579, %588 : vector<8x1xi32>
    %590 = arith.andi %589, %581 : vector<8x1xi1>
    %c3_i32_137 = arith.constant 3 : i32
    %591 = vector.broadcast %c3_i32_137 : i32 to vector<8x1xi32>
    %592 = arith.cmpi eq, %579, %591 : vector<8x1xi32>
    %593 = arith.andi %592, %581 : vector<8x1xi1>
    %c4_i32_138 = arith.constant 4 : i32
    %594 = vector.broadcast %c4_i32_138 : i32 to vector<8x1xi32>
    %595 = arith.cmpi eq, %579, %594 : vector<8x1xi32>
    %596 = arith.andi %595, %581 : vector<8x1xi1>
    %597 = vector.broadcast %580 : vector<8x1xi32> to vector<8x128xi32>
    %598 = arith.cmpi eq, %6, %597 : vector<8x128xi32>
    %599 = arith.extui %598 : vector<8x128xi1> to vector<8x128xi32>
    %600 = arith.sitofp %599 : vector<8x128xi32> to vector<8x128xf32>
    %601 = vector.broadcast %580 : vector<8x1xi32> to vector<8x8xi32>
    %602 = arith.cmpi eq, %7, %601 : vector<8x8xi32>
    %603 = arith.extui %602 : vector<8x8xi1> to vector<8x8xi32>
    %604 = arith.sitofp %603 : vector<8x8xi32> to vector<8x8xf32>
    %cst_139 = arith.constant dense<0.000000e+00> : vector<8x128xf32>
    %605 = tpu.matmul %604, %3, %cst_139 {dimension_numbers = #tpu.dot_dimension_numbers<[1], [0], [0], [1], [0, 0, 1, 1], [], []>} : vector<8x8xf32>, vector<8x128xf32>, vector<8x128xf32> -> vector<8x128xf32>
    %c1_i32_140 = arith.constant 1 : i32
    %606 = vector.broadcast %c1_i32_140 : i32 to vector<8x1xi32>
    %607 = arith.cmpi eq, %578, %606 : vector<8x1xi32>
    %608 = vector.shape_cast %607 : vector<8x1xi1> to vector<8x1xi1>
    %609 = vector.broadcast %608 : vector<8x1xi1> to vector<8x128xi1>
    %610 = arith.select %609, %566, %571 : vector<8x128xi1>, vector<8x128xf32>
    %611 = arith.minimumf %566, %571 : vector<8x128xf32>
    %612 = arith.maximumf %566, %571 : vector<8x128xf32>
    %cst_141 = arith.constant 1.000000e+00 : f32
    %613 = vector.broadcast %cst_141 : f32 to vector<8x128xf32>
    %614 = arith.subf %613, %610 : vector<8x128xf32>
    %cst_142 = arith.constant 0.000000e+00 : f32
    %615 = vector.broadcast %cst_142 : f32 to vector<8x128xf32>
    %616 = vector.shape_cast %593 : vector<8x1xi1> to vector<8x1xi1>
    %617 = vector.broadcast %616 : vector<8x1xi1> to vector<8x128xi1>
    %618 = arith.select %617, %612, %615 : vector<8x128xi1>, vector<8x128xf32>
    %619 = vector.shape_cast %590 : vector<8x1xi1> to vector<8x1xi1>
    %620 = vector.broadcast %619 : vector<8x1xi1> to vector<8x128xi1>
    %621 = arith.select %620, %611, %618 : vector<8x128xi1>, vector<8x128xf32>
    %622 = vector.shape_cast %596 : vector<8x1xi1> to vector<8x1xi1>
    %623 = vector.broadcast %622 : vector<8x1xi1> to vector<8x128xi1>
    %624 = arith.select %623, %614, %621 : vector<8x128xi1>, vector<8x128xf32>
    %625 = vector.shape_cast %587 : vector<8x1xi1> to vector<8x1xi1>
    %626 = vector.broadcast %625 : vector<8x1xi1> to vector<8x128xi1>
    %627 = arith.select %626, %605, %624 : vector<8x128xi1>, vector<8x128xf32>
    %628 = vector.shape_cast %584 : vector<8x1xi1> to vector<8x1xi1>
    %629 = vector.broadcast %628 : vector<8x1xi1> to vector<8x128xi1>
    %630 = arith.select %629, %600, %627 : vector<8x128xi1>, vector<8x128xf32>
    %631 = arith.ori %590, %593 : vector<8x1xi1>
    %632 = arith.ori %596, %587 : vector<8x1xi1>
    %c1_i32_143 = arith.constant 1 : i32
    %633 = vector.broadcast %c1_i32_143 : i32 to vector<8x1xi32>
    %634 = arith.subi %578, %633 : vector<8x1xi32>
    %c-1_i32_144 = arith.constant -1 : i32
    %635 = vector.broadcast %c-1_i32_144 : i32 to vector<8x1xi32>
    %636 = arith.select %632, %634, %635 : vector<8x1xi1>, vector<8x1xi32>
    %c0_i32_145 = arith.constant 0 : i32
    %637 = vector.broadcast %c0_i32_145 : i32 to vector<8x1xi32>
    %638 = arith.select %631, %637, %636 : vector<8x1xi1>, vector<8x1xi32>
    %639 = arith.select %584, %578, %638 : vector<8x1xi1>, vector<8x1xi32>
    %c0_i32_146 = arith.constant 0 : i32
    %640 = vector.broadcast %c0_i32_146 : i32 to vector<8x1xi32>
    %641 = arith.cmpi eq, %639, %640 : vector<8x1xi32>
    %642 = vector.shape_cast %641 : vector<8x1xi1> to vector<8x1xi1>
    %643 = vector.broadcast %642 : vector<8x1xi1> to vector<8x128xi1>
    %644 = arith.select %643, %630, %566 : vector<8x128xi1>, vector<8x128xf32>
    %c1_i32_147 = arith.constant 1 : i32
    %645 = vector.broadcast %c1_i32_147 : i32 to vector<8x1xi32>
    %646 = arith.cmpi eq, %639, %645 : vector<8x1xi32>
    %647 = vector.shape_cast %646 : vector<8x1xi1> to vector<8x1xi1>
    %648 = vector.broadcast %647 : vector<8x1xi1> to vector<8x128xi1>
    %649 = arith.select %648, %630, %571 : vector<8x128xi1>, vector<8x128xf32>
    %650 = arith.ori %590, %593 : vector<8x1xi1>
    %c-1_i32_148 = arith.constant -1 : i32
    %c0_i32_149 = arith.constant 0 : i32
    %651 = vector.broadcast %c-1_i32_148 : i32 to vector<8x1xi32>
    %652 = vector.broadcast %c0_i32_149 : i32 to vector<8x1xi32>
    %653 = arith.select %650, %651, %652 : vector<8x1xi1>, vector<8x1xi32>
    %c1_i32_150 = arith.constant 1 : i32
    %654 = vector.broadcast %c1_i32_150 : i32 to vector<8x1xi32>
    %655 = arith.select %584, %654, %653 : vector<8x1xi1>, vector<8x1xi32>
    %656 = arith.addi %578, %655 : vector<8x1xi32>
    %c1_i32_151 = arith.constant 1 : i32
    %657 = vector.broadcast %c1_i32_151 : i32 to vector<8x1xi32>
    %658 = arith.cmpi eq, %656, %657 : vector<8x1xi32>
    %659 = vector.shape_cast %658 : vector<8x1xi1> to vector<8x1xi1>
    %660 = vector.broadcast %659 : vector<8x1xi1> to vector<8x128xi1>
    %661 = arith.select %660, %644, %649 : vector<8x128xi1>, vector<8x128xf32>
    %cst_152 = arith.constant 2.000000e+00 : f32
    %662 = vector.broadcast %cst_152 : f32 to vector<8x128xf32>
    %663 = arith.mulf %661, %662 : vector<8x128xf32>
    %c0_153 = arith.constant 0 : index
    %c0_154 = arith.constant 0 : index
    %664 = vector.load %arg5[%c0_153, %c0_154] : memref<8x128xf32, #tpu.memory_space<vmem>>, vector<8x128xf32>
    %665 = arith.addf %663, %664 : vector<8x128xf32>
    %cst_155 = arith.constant 3.000000e+00 : f32
    %666 = vector.broadcast %cst_155 : f32 to vector<8x128xf32>
    %667 = arith.divf %665, %666 : vector<8x128xf32>
    %cst_156 = arith.constant 1.000000e-10 : f32
    %668 = vector.broadcast %cst_156 : f32 to vector<8x128xf32>
    %669 = arith.addf %667, %668 : vector<8x128xf32>
    %cst_157 = arith.constant 1.000000e+00 : f32
    %670 = vector.broadcast %cst_157 : f32 to vector<8x128xf32>
    %671 = arith.subf %670, %667 : vector<8x128xf32>
    %cst_158 = arith.constant 1.000000e-10 : f32
    %672 = vector.broadcast %cst_158 : f32 to vector<8x128xf32>
    %673 = arith.addf %671, %672 : vector<8x128xf32>
    %674 = arith.divf %669, %673 : vector<8x128xf32>
    %675 = math.log %674 : vector<8x128xf32>
    %c0_159 = arith.constant 0 : index
    %c0_160 = arith.constant 0 : index
    %676 = vector.load %arg6[%c0_159, %c0_160] : memref<8x128xf32, #tpu.memory_space<vmem>>, vector<8x128xf32>
    tpu.vector_store %arg6[%c0_159, %c0_160], %675 {strides = array<i32>} : memref<8x128xf32, #tpu.memory_space<vmem>>, vector<8x128xf32>,
    return
  }
  func.func @transform_0(%arg0: i32, %arg1: i32) -> (i32, i32) {
    %c0_i32 = arith.constant 0 : i32
    %c0_i32_0 = arith.constant 0 : i32
    return %arg0, %c0_i32 : i32, i32
  }
  func.func @transform_1(%arg0: i32, %arg1: i32) -> (i32, i32) {
    %c0_i32 = arith.constant 0 : i32
    %c0_i32_0 = arith.constant 0 : i32
    return %arg0, %c0_i32 : i32, i32
  }
  func.func @transform_2(%arg0: i32, %arg1: i32) -> (i32, i32) {
    %c0_i32 = arith.constant 0 : i32
    %c0_i32_0 = arith.constant 0 : i32
    return %c0_i32, %arg1 : i32, i32
  }
  func.func @transform_3(%arg0: i32, %arg1: i32) -> (i32, i32) {
    %c0_i32 = arith.constant 0 : i32
    return %arg0, %arg1 : i32, i32
  }
  func.func @transform_4(%arg0: i32, %arg1: i32) -> (i32, i32) {
    %c0_i32 = arith.constant 0 : i32
    return %arg0, %arg1 : i32, i32
  }
}

</mosaic_0001>

<bundles_post_ra>
// kernel: tpu_custom_call.1
= control target key start
LH: loop header
LB: loop body
LE: loop exit
PB: predicated region body
PF: predicated region fallthrough
CT: control target
= control target key end

     0   :  { %9 = vsyncpa [#allocation3], 0  ;;  %s2269_s0 = inlined_call_operand.hbm [shape: s32[8,8], index: 0, kind: input, shape index: {}]   ;;  %s2270_s1 = inlined_call_operand.hbm [shape: s32[8,8], index: 1, kind: input, shape index: {}]   ;;  %s2271_s2 = inlined_call_operand.hbm [shape: f32[8,128], index: 2, kind: input, shape index: {}]   ;;  %s2272_s3 = inlined_call_operand.hbm [shape: f32[8,128], index: 3, kind: input, shape index: {}]   ;;  %s2273_s4 = inlined_call_operand.hbm [shape: f32[8,128], index: 4, kind: output, shape index: {}]  }
   0x1   :  { %10 = vsyncpa [#allocation6], 0 }
   0x2   :  { %11 = vsyncpa [#allocation9], 0  ;;  %s29_s17 = sshll.u32 %s2270_s1, 4  ;;  %s30_s17 = int_to_ptr.hbm [resolvable:$true] %s29_s17 }
   0x3   :  { %12 = vsyncpa [#allocation4], 0  ;;  %s1263_s18 = smov [#allocation5]   ;;  %s18_s22 = sshll.u32 %s2269_s0, 4  ;;  %s19_s22 = int_to_ptr.hbm [resolvable:$true] %s18_s22 }
   0x4   :  { %s31_s19 = sshll.u32 %s1263_s18, 4  ;;  %s1264_s23 = smov [#allocation2]   ;;  %s32_s19 = int_to_ptr.vmem [resolvable:$true] %s31_s19 }
   0x5   :  { %34 = dma.hbm_to_vmem [thread:$0]  %s30_s17, 128, %s32_s19, [#allocation6]  }
   0x6   :  { %s20_s24 = sshll.u32 %s1264_s23, 4  ;;  %s40_s27 = sshll.u32 %s2271_s2, 4  ;;  %s21_s24 = int_to_ptr.vmem [resolvable:$true] %s20_s24  ;;  %s41_s27 = int_to_ptr.hbm [resolvable:$true] %s40_s27 }
   0x7   :  { %23 = dma.hbm_to_vmem [thread:$0]  %s19_s22, 128, %s21_s24, [#allocation3]  }
   0x8   :  { %s51_s29 = sshll.u32 %s2272_s3, 4  ;;  %s1265_s30 = smov [#allocation7]   ;;  %s52_s29 = int_to_ptr.hbm [resolvable:$true] %s51_s29 }
   0x9   :  { %s42_s5 = sshll.u32 %s1265_s30, 4  ;;  %s1266_s0 = smov [#allocation8]   ;;  %s43_s5 = int_to_ptr.vmem [resolvable:$true] %s42_s5 }
   0xa   :  { %45 = dma.hbm_to_vmem [thread:$0]  %s41_s27, 128, %s43_s5, [#allocation6]  }
   0xb   :  { %s53_s6 = sshll.u32 %s1266_s0, 4  ;;  %s54_s6 = int_to_ptr.vmem [resolvable:$true] %s53_s6 }
   0xc   :  { %56 = dma.hbm_to_vmem [thread:$0]  %s52_s29, 128, %s54_s6, [#allocation9]  }
   0xd   :  { %1255 = dma.done.wait [#allocation3], 128  }
   0xe   :  { %1256 = vsyncadd [#allocation3], 4294967168 }
   0xf   :  { %1257 = dma.done.wait [#allocation6], 256  }
  0x10   :  { %1258 = vsyncadd [#allocation6], 4294967040 }
  0x11   :  { %1259 = dma.done.wait [#allocation9], 128  }
  0x12   :  { %1260 = vsyncadd [#allocation9], 4294967168  ;;  %v2322_v0 = vmov 0   ;;  %v1334_v1 = vld [vmem:[#allocation5] sm:$0xff]  ;;  %v1336_v2 = vld [vmem:[#allocation2] sm:$0xff]  ;;  %v1268_v5 = vmov 4294967295   ;;  %v77_v27 = vlaneseq }
  0x13   :  { %1079 = vset.pattern.permute.xlu0 %v2322_v0  ;;  %1080 = vset.pattern.permute.xlu1 %v2322_v0  ;;  %vm2278_vm0 = vcmp.eq.s32.totalorder %v1336_v2, 1  ;;  %vm2275_vm1 = vcmp.eq.s32.totalorder %v1336_v2, 2  ;;  %vm2276_vm2 = vcmp.eq.s32.totalorder %v1336_v2, 0  ;;  %vm2277_vm3 = vcmp.eq.s32.totalorder %v1336_v2, 3  ;;  %s1270_s2 = smov 1   ;;  %s1272_s3 = smov 127  }
  0x14   :  { %1081 = vset.pattern.permute.xlu2 %v2322_v0  ;;  %88 = vperm.xlu0 %1079, %v1334_v1   ;;  %v126_v3 = vsel %vm2278_vm0, 1, %v2322_v0  ;;  %vm2274_vm4 = vcmp.eq.s32.totalorder %v1336_v2, 4  ;;  %vm1351_vm5 = vmor %vm2275_vm1, %vm2277_vm3  ;;  %v132_v10 = vsel %vm2276_vm2, 1, %v2322_v0  ;;  %vm86_vm7 = vcmp.eq.s32.totalorder %v1336_v2, 5  ;;  %s1276_s7 = smov 126   ;;  %s1277_s8 = smov 122  }
  0x15   :  { %128 = vperm.xlu1 %1080, %v126_v3   ;;  %v139_v6 = vsel %vm1351_vm5, 0, %v1268_v5  ;;  %v120_v8 = vsel %vm2274_vm4, 1, %v2322_v0  ;;  %vm1269_vm9 = vmmov 1   ;;  %v167_v13 = vsel %vm86_vm7, 1, %v2322_v0  ;;  %s1278_s9 = smov 123   ;;  %s1279_s10 = smov 125  }
  0x16   :  { %v140_v7 = vsel %vm2276_vm2, 0, %v139_v6  ;;  %vm157_vm10 = vmxor %vm86_vm7, %vm1269_vm9  ;;  %v155_v14 = vsel %vm1351_vm5, 4294967295, %v2322_v0  ;;  %v2312_v15 = vmov 3   ;;  %v1273_v18 = vmov 1   ;;  %s1280_s11 = smov 124   ;;  %v76_v22 = vld [vmem:[#allocation7] sm:$0xff] }
  0x17   :  { %vm141_vm6 = vcmp.eq.s32.totalorder %v140_v7, 0  ;;  %vm148_vm8 = vcmp.eq.s32.totalorder %v140_v7, 1  ;;  %v158_v12 = vsel %vm157_vm10, 1, %v2322_v0  ;;  %v1382_v16 = vsel %vm2276_vm2, 1, %v155_v14  ;;  %115 = vmatpush.msra.mxu0 %v76_v22  ;;  %199 = vmatpush.msra.mxu1 %v76_v22  ;;  %s1285_s12 = smov 2   ;;  %s1286_s13 = smov 3  }
  0x18   :  { %v142_v9 = vsel %vm141_vm6, 1, %v2322_v0  ;;  %v149_v11 = vsel %vm148_vm8, 1, %v2322_v0  ;;  %v1023_v17 = vadd.s32 4294967295, %v1382_v16  ;;  %v2310_v19 = vmov 4   ;;  %314 = vmatpush.msra.mxu2 %v76_v22  ;;  %429 = vmatpush.msra.mxu3 %v76_v22  ;;  %s1287_s14 = smov 5   ;;  %s1288_s15 = smov 6  }
  0x19   :  { %144 = vperm.xlu2 %1081, %v142_v9   ;;  %v2316_v20 = vmov 2   ;;  %v2308_v21 = vmov 5   ;;  %544 = vmatpush.msrb.mxu0 %v76_v22  ;;  %v2306_v23 = vmov 6   ;;  %v2314_v24 = vmov 7   ;;  %s1289_s16 = smov 4   ;;  %s1290_s17 = smov 7  }
  0x1a   :  { %659 = vmatpush.msrb.mxu1 %v76_v22  ;;  %885 = vmatpush.msrb.mxu3 %v76_v22  ;;  %v1407_v28 = vand.u32 127, %v77_v27  ;;  %vm96_vm11 = vcmask 64512   ;;  %v1284_v31 = vmov 0.0   ;;  %v2354_v47 = vmov 0  ;;  %s1291_s18 = smov 121   ;;  %s1293_s19 = smov [#allocation10]  }
  0x1b   :  { %774 = vmatpush.msrb.mxu2 %v76_v22  ;;  %v2363_v55 = vmov 0  ;;  %s1003_s20 = sshll.u32 %s1293_s19, 4  ;;  %s1005_s23 = sshll.u32 %s2273_s4, 4  ;;  %s1004_s20 = int_to_ptr.vmem [resolvable:$true] %s1003_s20  ;;  %s1006_s23 = int_to_ptr.hbm [resolvable:$true] %s1005_s23 }
  0x1c   :  { %122 = vperm.xlu0 %1079, %v120_v8  }
  0x1d   :  { %134 = vperm.xlu1 %1080, %v132_v10  }
  0x21   :  { %151 = vperm.xlu2 %1081, %v149_v11  }
  0x24   :  { %159 = vrot.lane.b32.xlu0 %v158_v12, %s1270_s2 }
  0x25   :  { %1084 = vset.pattern.permute.xlu0 %v2312_v15  ;;  %168 = vrot.lane.b32.xlu1 %v167_v13, %s1272_s3 }
  0x26   :  { %1086 = vset.pattern.permute.xlu1 %v2308_v21 }
  0x29   :  { %1082 = vset.pattern.permute.xlu2 %v1273_v18 }
  0x2a   :  { %173 = vperm.xlu2 %1082, %v1334_v1  }
  0x2c   :  { %403 = vperm.xlu0 %1084, %v1334_v1  }
  0x2d   :  { %247 = vrot.lane.b32.xlu1 %v1023_v17, %s1270_s2 }
  0x32   :  { %251 = vrot.lane.b32.xlu2 %v1382_v16, %s1270_s2 }
  0x33   :  { %1083 = vset.pattern.permute.xlu2 %v2316_v20 }
  0x34   :  { %1085 = vset.pattern.permute.xlu0 %v2310_v19 }
  0x35   :  { %518 = vperm.xlu0 %1085, %v1334_v1   ;;  %283 = vrot.lane.b32.xlu1 %v167_v13, %s1276_s7 }
  0x3a   :  { %288 = vperm.xlu2 %1083, %v1334_v1  }
  0x3d   :  { %743 = vrot.lane.b32.xlu0 %v167_v13, %s1277_s8  ;;  %628 = vrot.lane.b32.xlu1 %v167_v13, %s1278_s9 }
  0x3e   :  { %1091 = vset.pattern.permute.xlu0 %v1273_v18 }
  0x42   :  { %398 = vrot.lane.b32.xlu2 %v167_v13, %s1279_s10 }
  0x43   :  { %1087 = vset.pattern.permute.xlu2 %v2306_v23 }
  0x45   :  { %633 = vperm.xlu1 %1086, %v1334_v1  }
  0x4a   :  { %513 = vrot.lane.b32.xlu2 %v167_v13, %s1280_s11 }
  0x4d   :  { %1088 = vset.pattern.permute.xlu1 %v2314_v24 }
  0x4e   :  { %859 = vperm.xlu1 %1088, %v1334_v1  }
  0x52   :  { %748 = vperm.xlu2 %1087, %v1334_v1  }
  0x56   :  { %1089 = vset.pattern.permute.xlu1 %v1273_v18 }
  0x5a   :  { %1090 = vset.pattern.permute.xlu2 %v1273_v18 }
  0x73   :  { %v1403_v25 = vpop.permute.xlu2 %144 }
  0x7b   :  { %v1405_v26 = vpop.permute.xlu2 %151 }
  0x84   :  { %v174_v30 = vpop.permute.xlu2 %173 }
  0x85   :  { %vm175_vm13 = vcmp.eq.s32.totalorder %v1407_v28, %v174_v30 }
  0x86   :  { %v89_v29 = vpop.permute.xlu0 %88  ;;  %v1417_v34 = vsel %vm175_vm13, 1.0, %v1284_v31 }
  0x87   :  { %vm90_vm12 = vcmp.eq.s32.totalorder %v1407_v28, %v89_v29  ;;  %v1414_v33 = vpop.permute.xlu1 %128  ;;  %1022 = vmatmul.msk.f32.vlgmr.msra.gmra.mxu1 %vm96_vm11, %v1417_v34 }
  0x88   :  { %v1412_v32 = vsel %vm90_vm12, 1.0, %v1284_v31 }
  0x89   :  { %1019 = vmatmul.msk.f32.vlgmr.msra.gmra.mxu0 %vm96_vm11, %v1412_v32 }
  0x8c   :  { %v1425_v36 = vpop.permute.xlu2 %251 }
  0x8e   :  { %v1423_v35 = vpop.permute.xlu0 %122 }
  0x8f   :  { %v1427_v37 = vpop.permute.xlu1 %134 }
  0x94   :  { %v289_v39 = vpop.permute.xlu2 %288 }
  0x95   :  { %vm290_vm15 = vcmp.eq.s32.totalorder %v1407_v28, %v289_v39 }
  0x96   :  { %v160_v38 = vpop.permute.xlu0 %159  ;;  %v1438_v42 = vsel %vm290_vm15, 1.0, %v1284_v31 }
  0x97   :  { %vm161_vm14 = vcmp.ne.s32.totalorder %v160_v38, 0  ;;  %v169_v40 = vpop.permute.xlu1 %168  ;;  %1026 = vmatmul.msk.f32.vlgmr.msra.gmra.mxu2 %vm96_vm11, %v1438_v42 }
  0x98   :  { %vm1433_vm5 = vmand %vm2274_vm4, %vm161_vm14  ;;  %vm170_vm6 = vcmp.ne.s32.totalorder %v169_v40, 0 }
  0x99   :  { %v226_v43 = vsel %vm1433_vm5, 1, %v2322_v0  ;;  %vm1446_vm8 = vmand %vm2275_vm1, %vm161_vm14 }
  0x9a   :  { %vm1454_vm10 = vmor %vm86_vm7, %vm170_vm6  ;;  %228 = vperm.xlu0 %1091, %v226_v43   ;;  %v220_v46 = vsel %vm1446_vm8, 1, %v2322_v0 }
  0x9b   :  { %vm273_vm12 = vmxor %vm1454_vm10, %vm1269_vm9  ;;  %222 = vperm.xlu2 %1090, %v220_v46   ;;  %v2351_v46 = vmov 0 }
  0x9c   :  { %vm1467_vm13 = vmand %vm2277_vm3, %vm161_vm14  ;;  %v399_v50 = vpop.permute.xlu2 %398  ;;  %v274_v51 = vsel %vm273_vm12, 1, %v2322_v0 }
  0x9d   :  { %v214_v48 = vsel %vm1467_vm13, 1, %v2322_v0  ;;  %vm1482_vm15 = vmand %vm2276_vm2, %vm161_vm14  ;;  %vm400_vm4 = vcmp.ne.s32.totalorder %v399_v50, 0 }
  0x9e   :  { %216 = vperm.xlu1 %1089, %v214_v48   ;;  %v404_v49 = vpop.permute.xlu0 %403  ;;  %vm1491_vm6 = vmand %vm2278_vm0, %vm161_vm14  ;;  %v238_v56 = vsel %vm1482_vm15, 1, %v2322_v0 }
  0x9f   :  { %vm405_vm7 = vcmp.eq.s32.totalorder %v1407_v28, %v404_v49  ;;  %v248_v52 = vpop.permute.xlu1 %247  ;;  %vm244_vm12 = vmor %vm1446_vm8, %vm1467_vm13  ;;  %v232_v57 = vsel %vm1491_vm6, 1, %v2322_v0  ;;  %v2357_v49 = vmov 0 }
  0xa0   :  { %v1477_v53 = vsel %vm405_vm7, 1.0, %v1284_v31  ;;  %v268_v59 = vsel %vm244_vm12, 4294967295, %v2322_v0  ;;  %vm245_vm7 = vmor %vm1433_vm5, %vm1491_vm6 }
  0xa1   :  { %2341 = vst [vmem:[#allocation15_spill] sm:$0xff] %v1477_v53  ;;  %1030 = vmatmul.msk.f32.vlgmr.msra.gmra.mxu3 %vm96_vm11, %v1477_v53  ;;  %v269_v63 = vsel %vm1482_vm15, 1, %v268_v59  ;;  %v249_v1 = vsel %vm245_vm7, %v248_v52, 4294967295  ;;  %v2360_v52 = vmov 0 }
  0xa2   :  { %275 = vrot.lane.b32.xlu0 %v274_v51, %s1285_s12  ;;  %v250_v4 = vsel %vm244_vm12, 0, %v249_v1  ;;  %v2375_v1 = vmov 0 }
  0xa3   :  { %240 = vperm.xlu2 %1090, %v238_v56   ;;  %v253_v7 = vsel %vm1482_vm15, %v1425_v36, %v250_v4  ;;  %v2366_v56 = vmov 0 }
  0xa4   :  { %v514_v60 = vpop.permute.xlu2 %513  ;;  %vm254_vm8 = vcmp.eq.s32.totalorder %v253_v7, 0  ;;  %vm261_vm15 = vcmp.eq.s32.totalorder %v253_v7, 1 }
  0xa5   :  { %vm515_vm3 = vcmp.ne.s32.totalorder %v514_v60, 0  ;;  %v255_v11 = vsel %vm254_vm8, 1, %v2322_v0  ;;  %v262_v12 = vsel %vm261_vm15, 1, %v2322_v0  ;;  %vm2353_vm15 = vcmp.eq.s32.totalorder %v1336_v2, 3 }
  0xa6   :  { %234 = vperm.xlu1 %1089, %v232_v57   ;;  %v2369_v57 = vmov 0 }
  0xa7   :  { %v519_v58 = vpop.permute.xlu0 %518  ;;  %v284_v61 = vpop.permute.xlu1 %283 }
  0xa8   :  { %vm520_vm14 = vcmp.eq.s32.totalorder %v1407_v28, %v519_v58  ;;  %vm285_vm1 = vcmp.ne.s32.totalorder %v284_v61, 0  ;;  %v2372_v61 = vmov 0 }
  0xa9   :  { %v1518_v62 = vsel %vm520_vm14, 1.0, %v1284_v31  ;;  %vm286_vm2 = vmor %vm1454_vm10, %vm285_vm1 }
  0xaa   :  { %2346 = vst [vmem:[#allocation16_spill] sm:$0xff] %v1518_v62  ;;  %1034 = vmatmul.msk.f32.vlgmr.msrb.gmra.mxu0 %vm96_vm11, %v1518_v62  ;;  %vm388_vm0 = vmxor %vm286_vm2, %vm1269_vm9 }
  0xab   :  { %270 = vrot.lane.b32.xlu2 %v269_v63, %s1272_s3  ;;  %vm401_vm5 = vmor %vm286_vm2, %vm400_vm4  ;;  %v389_v3 = vsel %vm388_vm0, 1, %v2322_v0 }
  0xac   :  { %1093 = vset.pattern.permute.xlu2 %v2316_v20  ;;  %vm516_vm6 = vmor %vm401_vm5, %vm515_vm3  ;;  %v749_v14 = vpop.permute.xlu2 %748 }
  0xad   :  { %vm618_vm1 = vmxor %vm516_vm6, %vm1269_vm9  ;;  %vm750_vm14 = vcmp.eq.s32.totalorder %v1407_v28, %v749_v14 }
  0xae   :  { %390 = vrot.lane.b32.xlu1 %v389_v3, %s1286_s13  ;;  %v619_v5 = vsel %vm618_vm1, 1, %v2322_v0  ;;  %vm503_vm2 = vmxor %vm401_vm5, %vm1269_vm9  ;;  %v1557_v17 = vsel %vm750_vm14, 1.0, %v1284_v31  ;;  %vm124_vm5 = vcmp.eq.s32.totalorder %v1423_v35, 1  ;;  %vm136_vm1 = vcmp.eq.s32.totalorder %v1427_v37, 1 }
  0xaf   :  { %620 = vrot.lane.b32.xlu0 %v619_v5, %s1287_s14  ;;  %v629_v6 = vpop.permute.xlu1 %628  ;;  %v744_v8 = vpop.permute.xlu0 %743  ;;  %v504_v10 = vsel %vm503_vm2, 1, %v2322_v0  ;;  %2347 = vst [vmem:[#allocation17_spill] sm:$0xff] %v1557_v17  ;;  %1042 = vmatmul.msk.f32.vlgmr.msrb.gmra.mxu2 %vm96_vm11, %v1557_v17  ;;  %v125_v38 = vsel %vm124_vm5, 1.0, %v1284_v31  ;;  %vm153_vm2 = vcmp.eq.s32.totalorder %v1405_v26, 1  ;;  %vm2356_vm14 = vcmp.eq.s32.totalorder %v1336_v2, 0 }
  0xb0   :  { %vm630_vm0 = vcmp.ne.s32.totalorder %v629_v6, 0  ;;  %vm745_vm10 = vcmp.ne.s32.totalorder %v744_v8, 0  ;;  %v2378_v8 = vmov 0 }
  0xb1   :  { %vm631_vm3 = vmor %vm516_vm6, %vm630_vm0  ;;  %vm130_vm6 = vcmp.eq.s32.totalorder %v1414_v33, 1  ;;  %vm146_vm0 = vcmp.eq.s32.totalorder %v1403_v25, 1 }
  0xb2   :  { %vm733_vm4 = vmxor %vm631_vm3, %vm1269_vm9 }
  0xb3   :  { %v734_v9 = vsel %vm733_vm4, 1, %v2322_v0  ;;  %vm746_vm13 = vmor %vm631_vm3, %vm745_vm10  ;;  %vm2350_vm10 = vcmp.eq.s32.totalorder %v1336_v2, 1 }
  0xb4   :  { %735 = vrot.lane.b32.xlu2 %v734_v9, %s1288_s15  ;;  %vm848_vm12 = vmxor %vm746_vm13, %vm1269_vm9  ;;  %v2381_v9 = vmov 0 }
  0xb5   :  { %v849_v13 = vsel %vm848_vm12, 1, %v2322_v0 }
  0xb6   :  { %505 = vrot.lane.b32.xlu1 %v504_v10, %s1289_s16 }
  0xb7   :  { %257 = vperm.xlu0 %1091, %v255_v11   ;;  %v634_v18 = vpop.permute.xlu1 %633  ;;  %v2384_v11 = vmov 0 }
  0xb8   :  { %vm635_vm9 = vcmp.eq.s32.totalorder %v1407_v28, %v634_v18 }
  0xb9   :  { %v1563_v22 = vsel %vm635_vm9, 1.0, %v1284_v31 }
  0xba   :  { %2348 = vst [vmem:[#allocation18_spill] sm:$0xff] %v1563_v22  ;;  %1038 = vmatmul.msk.f32.vlgmr.msrb.gmra.mxu1 %vm96_vm11, %v1563_v22  ;;  %v2441_v22 = vmov 2  }
  0xbe   :  { %264 = vperm.xlu1 %1089, %v262_v12  }
  0xbf   :  { %850 = vrot.lane.b32.xlu0 %v849_v13, %s1290_s17 }
  0xc0   :  { %1094 = vset.pattern.permute.xlu0 %v2316_v20  ;;  %v860_v27 = vpop.permute.xlu1 %859 }
  0xc1   :  { %vm861_vm7 = vcmp.eq.s32.totalorder %v1407_v28, %v860_v27  ;;  %v2391_v27 = vmov 0 }
  0xc2   :  { %v1569_v29 = vsel %vm861_vm7, 1.0, %v1284_v31  ;;  %vm2359_vm7 = vcmp.eq.s32.totalorder %v1336_v2, 2 }
  0xc3   :  { %2349 = vst [vmem:[#allocation19_spill] sm:$0xff] %v1569_v29  ;;  %1046 = vmatmul.msk.f32.vlgmr.msrb.gmra.mxu3 %vm96_vm11, %v1569_v29 }
  0xc6   :  { %1092 = vset.pattern.permute.xlu1 %v2316_v20 }
  0xf5   :  { %v223_v30 = vpop.permute.xlu2 %222 }
  0xf6   :  { %vm224_vm3 = vcmp.eq.s32.totalorder %v223_v30, 1  ;;  %v2394_v30 = vmov 0 }
  0xfd   :  { %v1573_v36 = vpop.permute.xlu2 %240 }
 0x105   :  { %v271_v40 = vpop.permute.xlu2 %270 }
 0x106   :  { %v117_v39 = vpop.f32.mrf.mxu0  ;;  %v1691_v3 = vadd.s32 %v271_v40, %v1382_v16 }
 0x107   :  { %v131_v28 = vsel %vm130_vm6, %v117_v39, %v125_v38  ;;  %vm2362_vm6 = vcmp.eq.s32.totalorder %v1336_v2, 4 }
 0x108   :  { %v137_v41 = vsel %vm136_vm1, %v1412_v32, %v131_v28  ;;  %v2396_v28 = vmov 0 }
 0x109   :  { %v1582_v43 = vsel %vm146_vm0, %v137_v41, 0.0  ;;  %v1584_v44 = vsel %vm153_vm2, %v137_v41, 0.0  ;;  %vm2365_vm0 = vmmov %vm2350_vm10 }
 0x10a   :  { %v211_v33 = vmin.f32 %v1582_v43, %v1584_v44  ;;  %v212_v31 = vmax.f32 %v1582_v43, %v1584_v44 }
 0x10c   :  { %v1590_v35 = vpop.permute.xlu0 %228 }
 0x10e   :  { %v1592_v37 = vpop.permute.xlu2 %735 }
 0x10f   :  { %vm2280_vm4 = vcmp.ne.s32.totalorder %v1592_v37, 0 }
 0x110   :  { %v217_v45 = vpop.permute.xlu1 %216  ;;  %vm1601_vm13 = vmand %vm2350_vm10, %vm2280_vm4 }
 0x111   :  { %vm218_vm11 = vcmp.eq.s32.totalorder %v217_v45, 1  ;;  %v2352_v46 = vsel %vm1601_vm13, 4294967295, %v2351_v46 }
 0x112   :  { %v219_v25 = vsel %vm218_vm11, %v212_v31, 0.0  ;;  %vm2368_vm11 = vmmov %vm2362_vm6  ;;  %v1027_v31 = vadd.s32 4294967295, %v1691_v3 }
 0x113   :  { %v1595_v26 = vsel %vm224_vm3, %v211_v33, %v219_v25  ;;  %vm1650_vm3 = vmand %vm2368_vm11, %vm2280_vm4  ;;  %vm2383_vm4 = vcmp.eq.s32.totalorder %v1336_v2, 4 }
 0x114   :  { %v276_v32 = vpop.permute.xlu0 %275  ;;  %v2370_v57 = vsel %vm1650_vm3, 4294967295, %v2369_v57 }
 0x115   :  { %vm277_vm8 = vcmp.ne.s32.totalorder %v276_v32, 0 }
 0x116   :  { %vm1607_vm12 = vmand %vm2353_vm15, %vm277_vm8 }
 0x117   :  { %v2355_v47 = vsel %vm1607_vm12, 4294967295, %v2354_v47  ;;  %v329_v48 = vsel %vm1607_vm12, 1, %v2322_v0  ;;  %vm1616_vm9 = vmand %vm2356_vm14, %vm277_vm8 }
 0x118   :  { %v2358_v49 = vsel %vm1616_vm9, 4294967295, %v2357_v49  ;;  %v1620_v50 = vpop.permute.xlu1 %234  ;;  %331 = vperm.xlu1 %1092, %v329_v48   ;;  %v353_v51 = vsel %vm1616_vm9, 1, %v2322_v0  ;;  %vm1627_vm5 = vmand %vm2359_vm7, %vm277_vm8  ;;  %v2402_v48 = vmov 0 }
 0x119   :  { %v2361_v52 = vsel %vm1627_vm5, 4294967295, %v2360_v52  ;;  %355 = vperm.xlu0 %1094, %v353_v51   ;;  %v335_v54 = vsel %vm1627_vm5, 1, %v2322_v0  ;;  %vm1636_vm1 = vmand %vm2362_vm6, %vm277_vm8 }
 0x11a   :  { %v2364_v55 = vsel %vm1636_vm1, 4294967295, %v2363_v55  ;;  %337 = vperm.xlu2 %1093, %v335_v54   ;;  %vm1642_vm2 = vmand %vm2365_vm0, %vm277_vm8  ;;  %v341_v58 = vsel %vm1636_vm1, 1, %v2322_v0 }
 0x11b   :  { %v2367_v56 = vsel %vm1642_vm2, 4294967295, %v2366_v56  ;;  %v347_v60 = vsel %vm1642_vm2, 1, %v2322_v0  ;;  %vm2371_vm14 = vmmov %vm2365_vm0  ;;  %vm2374_vm0 = vcmp.eq.s32.totalorder %v1336_v2, 2 }
 0x11c   :  { %vm2279_vm6 = vmor %vm1627_vm5, %vm1607_vm12  ;;  %vm2390_vm5 = vcmp.eq.s32.totalorder %v1336_v2, 1 }
 0x11d   :  { %v383_v5 = vsel %vm2279_vm6, 4294967295, %v2322_v0  ;;  %vm2380_vm6 = vcmp.eq.s32.totalorder %v1336_v2, 3  ;;  %vm2393_vm1 = vmmov %vm2390_vm5 }
 0x11e   :  { %v384_v7 = vsel %vm1616_vm9, 1, %v383_v5  ;;  %vm2386_vm9 = vmmov %vm2383_vm4 }
 0x120   :  { %v391_v59 = vpop.permute.xlu1 %390  ;;  %343 = vperm.xlu1 %1092, %v341_v58   ;;  %v2410_v58 = vmov 0 }
 0x121   :  { %vm392_vm15 = vcmp.ne.s32.totalorder %v391_v59, 0  ;;  %1097 = vset.pattern.permute.xlu0 %v2312_v15  ;;  %v621_v12 = vpop.permute.xlu0 %620 }
 0x122   :  { %349 = vperm.xlu2 %1093, %v347_v60   ;;  %vm1672_vm7 = vmand %vm2371_vm14, %vm392_vm15  ;;  %v2412_v60 = vmov 0 }
 0x123   :  { %v2373_v61 = vsel %vm1672_vm7, 4294967295, %v2372_v61  ;;  %v462_v63 = vsel %vm1672_vm7, 1, %v2322_v0  ;;  %vm1686_vm11 = vmand %vm2374_vm0, %vm392_vm15  ;;  %vm2377_vm0 = vcmp.eq.s32.totalorder %v1336_v2, 0 }
 0x124   :  { %464 = vperm.xlu0 %1097, %v462_v63   ;;  %v2376_v1 = vsel %vm1686_vm11, 4294967295, %v2375_v1  ;;  %v450_v4 = vsel %vm1686_vm11, 1, %v2322_v0  ;;  %vm1712_vm8 = vmand %vm2377_vm0, %vm392_vm15 }
 0x125   :  { %v2379_v8 = vsel %vm1712_vm8, 4294967295, %v2378_v8  ;;  %vm1720_vm10 = vmand %vm2380_vm6, %vm392_vm15  ;;  %v468_v10 = vsel %vm1712_vm8, 1, %v2322_v0  ;;  %vm2294_vm6 = vcmp.ne.s32.totalorder %v621_v12, 0 }
 0x126   :  { %v2382_v9 = vsel %vm1720_vm10, 4294967295, %v2381_v9  ;;  %v444_v13 = vsel %vm1720_vm10, 1, %v2322_v0  ;;  %vm1761_vm3 = vmand %vm2393_vm1, %vm2294_vm6  ;;  %vm2405_vm1 = vcmp.eq.s32.totalorder %v1336_v2, 2 }
 0x127   :  { %v2395_v30 = vsel %vm1761_vm3, 4294967295, %v2394_v30  ;;  %v692_v32 = vsel %vm1761_vm3, 1, %v2322_v0  ;;  %vm2408_vm3 = vcmp.ne.s32.totalorder %v1592_v37, 0 }
 0x128   :  { %1096 = vset.pattern.permute.xlu1 %v2312_v15  ;;  %v506_v6 = vpop.permute.xlu1 %505 }
 0x129   :  { %452 = vperm.xlu1 %1096, %v450_v4   ;;  %vm2282_vm14 = vcmp.ne.s32.totalorder %v506_v6, 0  ;;  %vm2389_vm12 = vcmp.ne.s32.totalorder %v506_v6, 0  ;;  %v1809_v45 = vpop.permute.xlu0 %257 }
 0x12a   :  { %366 = vrot.lane.b32.xlu2 %v1691_v3, %s1285_s12  ;;  %vm1730_vm0 = vmand %vm2383_vm4, %vm2282_vm14 }
 0x12b   :  { %1095 = vset.pattern.permute.xlu2 %v2312_v15  ;;  %v2385_v11 = vsel %vm1730_vm0, 4294967295, %v2384_v11  ;;  %v571_v14 = vsel %vm1730_vm0, 1, %v2322_v0  ;;  %vm1743_vm4 = vmand %vm2386_vm9, %vm392_vm15  ;;  %vm2404_vm15 = vcmp.ne.s32.totalorder %v506_v6, 0  ;;  %vm2409_vm0 = vcmp.eq.s32.totalorder %v1336_v2, 0 }
 0x12c   :  { %385 = vrot.lane.b32.xlu0 %v384_v7, %s1276_s7  ;;  %vm2289_vm14 = vmor %vm1686_vm11, %vm1720_vm10  ;;  %v456_v39 = vsel %vm1743_vm4, 1, %v2322_v0  ;;  %vm2418_vm10 = vcmp.ne.s32.totalorder %v621_v12, 0 }
 0x12d   :  { %1099 = vset.pattern.permute.xlu0 %v2310_v19  ;;  %vm1754_vm2 = vmand %vm2390_vm5, %vm2389_vm12  ;;  %v498_v38 = vsel %vm2289_vm14, 4294967295, %v2322_v0  ;;  %vm2399_vm14 = vcmp.eq.s32.totalorder %v1336_v2, 3 }
 0x12e   :  { %v2392_v27 = vsel %vm1754_vm2, 4294967295, %v2391_v27  ;;  %v577_v40 = vsel %vm1754_vm2, 1, %v2322_v0  ;;  %vm1785_vm5 = vmand %vm2386_vm9, %vm2294_vm6  ;;  %v499_v41 = vsel %vm1712_vm8, 1, %v498_v38 }
 0x12f   :  { %v2397_v28 = vsel %vm1785_vm5, 4294967295, %v2396_v28  ;;  %vm2398_vm9 = vmmov %vm2389_vm12 }
 0x130   :  { %vm1804_vm12 = vmand %vm2399_vm14, %vm2398_vm9 }
 0x131   :  { %470 = vperm.xlu1 %1096, %v468_v10   ;;  %v559_v25 = vsel %vm1804_vm12, 1, %v2322_v0  ;;  %vm1823_vm9 = vmand %vm2399_vm14, %vm2294_vm6  ;;  %v1855_v63 = vpop.permute.xlu0 %850  ;;  %vm2414_vm14 = vcmp.ne.s32.totalorder %v506_v6, 0  ;;  %v2420_v10 = vmov 0 }
 0x132   :  { %446 = vperm.xlu2 %1095, %v444_v13   ;;  %v2403_v48 = vsel %vm1823_vm9, 4294967295, %v2402_v48  ;;  %vm1830_vm2 = vmand %vm2405_vm1, %vm2404_vm15  ;;  %v674_v54 = vsel %vm1823_vm9, 1, %v2322_v0 }
 0x133   :  { %vm1841_vm8 = vmand %vm2409_vm0, %vm2408_vm3  ;;  %v565_v59 = vsel %vm1830_vm2, 1, %v2322_v0  ;;  %vm2301_vm0 = vcmp.ne.s32.totalorder %v1855_v63, 0 }
 0x134   :  { %573 = vperm.xlu0 %1099, %v571_v14   ;;  %v2411_v58 = vsel %vm1841_vm8, 4294967295, %v2410_v58  ;;  %vm1851_vm15 = vmand %vm2405_vm1, %vm2294_vm6  ;;  %v813_v4 = vsel %vm1841_vm8, 1, %v2322_v0  ;;  %vm2415_vm1 = vcmp.eq.s32.totalorder %v1336_v2, 0  ;;  %v2494_v14 = vmov 6  }
 0x135   :  { %v2413_v60 = vsel %vm1851_vm15, 4294967295, %v2412_v60  ;;  %vm2298_vm3 = vmor %vm1851_vm15, %vm1823_vm9  ;;  %v680_v7 = vsel %vm1851_vm15, 1, %v2322_v0 }
 0x136   :  { %vm1869_vm6 = vmand %vm2415_vm1, %vm2414_vm14  ;;  %v728_v6 = vsel %vm2298_vm3, 4294967295, %v2322_v0  ;;  %vm2422_vm14 = vcmp.eq.s32.totalorder %v1336_v2, 2  ;;  %vm2428_vm3 = vcmp.eq.s32.totalorder %v1336_v2, 0 }
 0x137   :  { %vm2419_vm11 = vmmov %vm2415_vm1  ;;  %v583_v13 = vsel %vm1869_vm6, 1, %v2322_v0 }
 0x138   :  { %vm1879_vm7 = vmand %vm2419_vm11, %vm2418_vm10  ;;  %vm2425_vm11 = vcmp.eq.s32.totalorder %v1336_v2, 3 }
 0x139   :  { %1100 = vset.pattern.permute.xlu1 %v2310_v19  ;;  %v2421_v10 = vsel %vm1879_vm7, 4294967295, %v2420_v10  ;;  %vm1896_vm10 = vmand %vm2422_vm14, %vm2301_vm0  ;;  %v729_v38 = vsel %vm1879_vm7, 1, %v728_v6 }
 0x13a   :  { %458 = vperm.xlu2 %1095, %v456_v39   ;;  %579 = vperm.xlu1 %1100, %v577_v40   ;;  %vm1904_vm1 = vmand %vm2425_vm11, %vm2301_vm0  ;;  %v698_v39 = vsel %vm1879_vm7, 1, %v2322_v0 }
 0x13b   :  { %vm2300_vm14 = vmor %vm1896_vm10, %vm1904_vm1 }
 0x13c   :  { %500 = vrot.lane.b32.xlu0 %v499_v41, %s1279_s10  ;;  %v954_v40 = vsel %vm2300_vm14, 4294967295, %v2322_v0  ;;  %vm2302_vm11 = vmor %vm1830_vm2, %vm1804_vm12  ;;  %v686_v41 = vsel %vm1785_vm5, 1, %v2322_v0  ;;  %vm2432_vm14 = vcmp.eq.s32.totalorder %v1336_v2, 2 }
 0x13d   :  { %1103 = vset.pattern.permute.xlu0 %v2308_v21  ;;  %vm1937_vm7 = vmand %vm2428_vm3, %vm2301_vm0  ;;  %vm2431_vm3 = vcmp.ne.s32.totalorder %v1592_v37, 0 }
 0x13e   :  { %vm1955_vm0 = vmand %vm2432_vm14, %vm2431_vm3 }
 0x142   :  { %1098 = vset.pattern.permute.xlu2 %v2310_v19  ;;  %362 = vrot.lane.b32.xlu1 %v1027_v31, %s1285_s12  ;;  %v2429_v31 = vmov 0 }
 0x143   :  { %561 = vperm.xlu2 %1098, %v559_v25   ;;  %1101 = vset.pattern.permute.xlu1 %v2308_v21  ;;  %v2430_v31 = vsel %vm1937_vm7, 4294967295, %v2429_v31  ;;  %v955_v25 = vsel %vm1937_vm7, 1, %v954_v40  ;;  %vm2436_vm7 = vcmp.eq.s32.totalorder %v1336_v2, 3 }
 0x144   :  { %694 = vperm.xlu0 %1103, %v692_v32   ;;  %v613_v32 = vsel %vm2302_vm11, 4294967295, %v2322_v0  ;;  %vm2435_vm11 = vmmov %vm2431_vm3  ;;  %vm2442_vm3 = vnez %v2364_v55 }
 0x145   :  { %vm1969_vm9 = vmand %vm2436_vm7, %vm2435_vm11  ;;  %vm2439_vm7 = vnez %v2370_v57 }
 0x146   :  { %v789_v6 = vsel %vm1969_vm9, 1, %v2322_v0  ;;  %vm2324_vm14 = vmor %vm1955_vm0, %vm1969_vm9  ;;  %v801_v37 = vsel %vm2439_vm7, 1, %v2322_v0 }
 0x14a   :  { %676 = vperm.xlu1 %1101, %v674_v54   ;;  %v614_v54 = vsel %vm1869_vm6, 1, %v613_v32 }
 0x14b   :  { %567 = vperm.xlu2 %1098, %v565_v59   ;;  %v2433_v59 = vmov 0 }
 0x14c   :  { %1106 = vset.pattern.permute.xlu0 %v2306_v23  ;;  %v2434_v59 = vsel %vm1955_vm0, 4294967295, %v2433_v59 }
 0x14d   :  { %815 = vperm.xlu0 %1106, %v813_v4   ;;  %v795_v4 = vsel %vm1955_vm0, 1, %v2322_v0  ;;  %vm2446_vm0 = vnez %v2355_v47 }
 0x152   :  { %682 = vperm.xlu1 %1101, %v680_v7   ;;  %v2437_v7 = vmov 0 }
 0x153   :  { %585 = vperm.xlu2 %1098, %v583_v13   ;;  %v2438_v7 = vsel %vm1969_vm9, 4294967295, %v2437_v7  ;;  %v807_v13 = vsel %vm1601_vm13, 1, %v2322_v0  ;;  %vm2445_vm9 = vnez %v2361_v52  ;;  %vm2448_vm13 = vnez %v2358_v49 }
 0x154   :  { %vm2447_vm15 = vmor %vm2445_vm9, %vm2446_vm0  ;;  %vm2459_vm0 = vnez %v2373_v61  ;;  %v316_v61 = vpop.f32.mrf.mxu2 }
 0x155   :  { %730 = vrot.lane.b32.xlu0 %v729_v38, %s1278_s9  ;;  %v843_v38 = vsel %vm2324_vm14, 4294967295, %v2322_v0 }
 0x156   :  { %1111 = vset.pattern.permute.xlu0 %v2322_v0  ;;  %v844_v40 = vsel %vm1841_vm8, 1, %v843_v38  ;;  %vm204_vm8 = vcmp.eq.s32.totalorder %v1382_v16, 1 }
 0x15a   :  { %700 = vperm.xlu1 %1101, %v698_v39  }
 0x15b   :  { %1102 = vset.pattern.permute.xlu2 %v2308_v21 }
 0x15c   :  { %688 = vperm.xlu2 %1102, %v686_v41  }
 0x15d   :  { %956 = vrot.lane.b32.xlu0 %v955_v25, %s1291_s18  ;;  %v2001_v25 = vpop.permute.xlu1 %264 }
 0x162   :  { %615 = vrot.lane.b32.xlu1 %v614_v54, %s1280_s11 }
 0x163   :  { %1104 = vset.pattern.permute.xlu1 %v2306_v23 }
 0x164   :  { %1105 = vset.pattern.permute.xlu2 %v2306_v23 }
 0x165   :  { %797 = vperm.xlu2 %1105, %v795_v4  }
 0x16a   :  { %791 = vperm.xlu1 %1104, %v789_v6  }
 0x16d   :  { %809 = vperm.xlu2 %1105, %v807_v13  }
 0x172   :  { %803 = vperm.xlu1 %1104, %v801_v37  }
 0x174   :  { %v1992_v39 = vpop.permute.xlu2 %337 }
 0x175   :  { %845 = vrot.lane.b32.xlu2 %v844_v40, %s1277_s8 }
 0x176   :  { %1109 = vset.pattern.permute.xlu2 %v2316_v20 }
 0x17a   :  { %1107 = vset.pattern.permute.xlu1 %v2322_v0 }
 0x17c   :  { %v1999_v41 = vpop.permute.xlu2 %349 }
 0x184   :  { %v367_v32 = vpop.permute.xlu2 %366 }
 0x18a   :  { %v2003_v54 = vpop.permute.xlu1 %331 }
 0x18b   :  { %v2007_v6 = vpop.permute.xlu0 %355 }
 0x18c   :  { %v2005_v4 = vpop.permute.xlu2 %446 }
 0x192   :  { %v2009_v13 = vpop.permute.xlu1 %343 }
 0x194   :  { %v2011_v37 = vpop.permute.xlu2 %458 }
 0x196   :  { %v2013_v38 = vpop.permute.xlu0 %464 }
 0x19b   :  { %v2015_v40 = vpop.permute.xlu1 %452 }
 0x19d   :  { %v2017_v23 = vpop.permute.xlu2 %561 }
 0x19e   :  { %2440 = vst [vmem:[#allocation20_spill] sm:$0xff] %v2017_v23  ;;  %v386_v21 = vpop.permute.xlu0 %385 }
 0x19f   :  { %v387_v19 = vadd.s32 %v386_v21, %v1691_v3 }
 0x1a1   :  { %481 = vrot.lane.b32.xlu0 %v387_v19, %s1286_s13  ;;  %vm434_vm11 = vcmp.eq.s32.totalorder %v387_v19, 1  ;;  %v1031_v15 = vadd.s32 4294967295, %v387_v19 }
 0x1a2   :  { %v435_v24 = vsel %vm434_vm11, 1, %v2322_v0  ;;  %vm2443_vm11 = vnez %v2367_v56 }
 0x1a3   :  { %437 = vperm.xlu1 %1107, %v435_v24   ;;  %477 = vrot.lane.b32.xlu2 %v1031_v15, %s1286_s13  ;;  %v2023_v20 = vpop.permute.xlu1 %470  ;;  %vm2444_vm14 = vmor %vm2442_vm3, %vm2443_vm11  ;;  %vm2462_vm3 = vnez %v2382_v9 }
 0x1a5   :  { %v2025_v29 = vpop.permute.xlu2 %567 }
 0x1a6   :  { %v2027_v17 = vpop.permute.xlu0 %573 }
 0x1ab   :  { %1108 = vset.pattern.permute.xlu1 %v2441_v22 }
 0x1ac   :  { %v2030_v62 = vpop.permute.xlu1 %579 }
 0x1ad   :  { %v2032_v53 = vpop.permute.xlu2 %585 }
 0x1ae   :  { %v501_v21 = vpop.permute.xlu0 %500 }
 0x1af   :  { %v502_v23 = vadd.s32 %v501_v21, %v387_v19  ;;  %v2449_v21 = vmov 0  }
 0x1b1   :  { %596 = vrot.lane.b32.xlu1 %v502_v23, %s1289_s16  ;;  %v1035_v0 = vadd.s32 4294967295, %v502_v23  ;;  %vm549_vm9 = vcmp.eq.s32.totalorder %v502_v23, 1 }
 0x1b2   :  { %v550_v49 = vsel %vm549_vm9, 1, %v2449_v21  ;;  %vm2464_vm9 = vnez %v2379_v8 }
 0x1b3   :  { %592 = vrot.lane.b32.xlu0 %v1035_v0, %s1289_s16  ;;  %v205_v0 = vsel %vm204_vm8, 1, %v2449_v21  ;;  %vm319_vm8 = vcmp.eq.s32.totalorder %v1691_v3, 1 }
 0x1b4   :  { %v363_v15 = vpop.permute.xlu1 %362 }
 0x1b5   :  { %v364_v24 = vsel %vm2444_vm14, %v363_v15, 4294967295  ;;  %vm2460_vm14 = vmor %vm1743_vm4, %vm2459_vm0  ;;  %vm2465_vm4 = vcmp.ne.s32.totalorder %v1855_v63, 0  ;;  %vm2469_vm0 = vnez %v2385_v11 }
 0x1b6   :  { %v365_v19 = vsel %vm2447_vm15, 0, %v364_v24  ;;  %v2052_v15 = vpop.permute.xlu2 %688  ;;  %v2054_v16 = vpop.permute.xlu0 %694 }
 0x1b7   :  { %v368_v22 = vsel %vm2448_vm13, %v367_v32, %v365_v19  ;;  %2450 = vst [vmem:[#allocation21_spill] sm:$0xff] %v2052_v15 }
 0x1b8   :  { %vm376_vm7 = vcmp.eq.s32.totalorder %v368_v22, 1  ;;  %vm369_vm5 = vcmp.eq.s32.totalorder %v368_v22, 0  ;;  %2451 = vst [vmem:[#allocation22_spill] sm:$0xff] %v2054_v16 }
 0x1b9   :  { %v377_v55 = vsel %vm376_vm7, 1, %v2449_v21  ;;  %v370_v56 = vsel %vm369_vm5, 1, %v2449_v21  ;;  %vm2461_vm7 = vnez %v2376_v1 }
 0x1ba   :  { %379 = vperm.xlu2 %1109, %v377_v55   ;;  %372 = vperm.xlu1 %1108, %v370_v56   ;;  %vm2463_vm11 = vmor %vm2461_vm7, %vm2462_vm3 }
 0x1bb   :  { %207 = vperm.xlu0 %1111, %v205_v0   ;;  %vm2472_vm3 = vmor %vm1830_vm2, %vm1804_vm12 }
 0x1bc   :  { %v2056_v47 = vpop.permute.xlu1 %676  ;;  %vm2474_vm2 = vmmov %vm2465_vm4 }
 0x1bd   :  { %2452 = vst [vmem:[#allocation23_spill] sm:$0xff] %v2056_v47 }
 0x1bf   :  { %v2061_v52 = vpop.permute.xlu2 %797  ;;  %v2065_v24 = vpop.permute.xlu0 %815 }
 0x1c0   :  { %2453 = vst [vmem:[#allocation24_spill] sm:$0xff] %v2061_v52 }
 0x1c1   :  { %2454 = vst [vmem:[#allocation25_spill] sm:$0xff] %v2065_v24 }
 0x1c2   :  { %1110 = vset.pattern.permute.xlu1 %v2449_v21  ;;  %1112 = vset.pattern.permute.xlu2 %v2449_v21 }
 0x1c3   :  { %552 = vperm.xlu1 %1110, %v550_v49  }
 0x1c4   :  { %v2063_v32 = vpop.permute.xlu1 %682 }
 0x1c7   :  { %v2069_v22 = vpop.permute.xlu2 %809  ;;  %v731_v0 = vpop.permute.xlu0 %730 }
 0x1c8   :  { %2455 = vst [vmem:[#allocation26_spill] sm:$0xff] %v2069_v22 }
 0x1cc   :  { %v2067_v19 = vpop.permute.xlu1 %700 }
 0x1cf   :  { %v846_v47 = vpop.permute.xlu2 %845  ;;  %v957_v52 = vpop.permute.xlu0 %956 }
 0x1d4   :  { %v616_v55 = vpop.permute.xlu1 %615 }
 0x1d5   :  { %v617_v56 = vadd.s32 %v616_v55, %v502_v23  ;;  %v320_v55 = vsel %vm319_vm8, 1, %v2449_v21 }
 0x1d7   :  { %711 = vrot.lane.b32.xlu2 %v617_v56, %s1287_s14  ;;  %v732_v16 = vadd.s32 %v731_v0, %v617_v56  ;;  %v1039_v15 = vadd.s32 4294967295, %v617_v56  ;;  %vm664_vm13 = vcmp.eq.s32.totalorder %v617_v56, 1  ;;  %v2456_v0 = vmov 7  }
 0x1d8   :  { %v665_v22 = vsel %vm664_vm13, 1, %v2449_v21  ;;  %v2458_v56 = vmov 4  }
 0x1d9   :  { %826 = vrot.lane.b32.xlu0 %v732_v16, %s1288_s15  ;;  %707 = vrot.lane.b32.xlu1 %v1039_v15, %s1287_s14  ;;  %v847_v49 = vadd.s32 %v846_v47, %v732_v16  ;;  %vm779_vm5 = vcmp.eq.s32.totalorder %v732_v16, 1  ;;  %v900_v15 = vsel %vm1904_vm1, 1, %v2449_v21 }
 0x1da   :  { %v780_v3 = vsel %vm779_vm5, 1, %v2449_v21  ;;  %vm2466_vm5 = vcmp.eq.s32.totalorder %v1336_v2, 4 }
 0x1db   :  { %v2074_v24 = vadd.s32 %v957_v52, %v847_v49  ;;  %v1047_v23 = vadd.s32 4294967295, %v847_v49  ;;  %vm890_vm15 = vcmp.eq.s32.totalorder %v847_v49, 1  ;;  %v1043_v52 = vadd.s32 4294967295, %v732_v16 }
 0x1dc   :  { %v891_v47 = vsel %vm890_vm15, 1, %v2449_v21  ;;  %vm2113_vm15 = vmand %vm2466_vm5, %vm2465_vm4  ;;  %vm236_vm4 = vcmp.eq.s32.totalorder %v1620_v50, 1  ;;  %vm242_vm5 = vcmp.eq.s32.totalorder %v1573_v36, 1 }
 0x1dd   :  { %v912_v8 = vsel %vm2113_vm15, 1, %v2449_v21 }
 0x1df   :  { %667 = vperm.xlu2 %1112, %v665_v22   ;;  %v2457_v22 = vmov 3  }
 0x1e1   :  { %322 = vperm.xlu0 %1111, %v320_v55   ;;  %933 = vrot.lane.b32.xlu1 %v1047_v23, %s1290_s17  ;;  %v2091_v23 = vpop.permute.xlu1 %791 }
 0x1e7   :  { %1113 = vset.pattern.permute.xlu2 %v2456_v0 }
 0x1e8   :  { %902 = vperm.xlu2 %1113, %v900_v15  }
 0x1e9   :  { %782 = vperm.xlu0 %1111, %v780_v3   ;;  %893 = vperm.xlu1 %1110, %v891_v47  }
 0x1f0   :  { %822 = vrot.lane.b32.xlu2 %v1043_v52, %s1288_s15  ;;  %v2107_v52 = vpop.permute.xlu1 %803 }
 0x1f1   :  { %1114 = vset.pattern.permute.xlu1 %v2457_v22  ;;  %1115 = vset.pattern.permute.xlu2 %v2457_v22 }
 0x1f2   :  { %1117 = vset.pattern.permute.xlu0 %v2458_v56 }
 0x1f8   :  { %937 = vrot.lane.b32.xlu2 %v847_v49, %s1290_s17 }
 0x1fd   :  { %v478_v55 = vpop.permute.xlu2 %477 }
 0x1fe   :  { %v479_v15 = vsel %vm2460_vm14, %v478_v55, 4294967295  ;;  %vm2470_vm14 = vnez %v2392_v27 }
 0x1ff   :  { %v480_v16 = vsel %vm2463_vm11, 0, %v479_v15  ;;  %vm2471_vm7 = vmor %vm2469_vm0, %vm2470_vm14  ;;  %vm259_vm0 = vcmp.eq.s32.totalorder %v1809_v45, 1  ;;  %vm266_vm14 = vcmp.eq.s32.totalorder %v2001_v25, 1 }
 0x213   :  { %v482_v3 = vpop.permute.xlu0 %481 }
 0x214   :  { %v483_v47 = vsel %vm2464_vm9, %v482_v3, %v480_v16  ;;  %v2473_v3 = vmov 5  }
 0x215   :  { %vm484_vm13 = vcmp.eq.s32.totalorder %v483_v47, 0  ;;  %vm491_vm8 = vcmp.eq.s32.totalorder %v483_v47, 1  ;;  %v2117_v1 = vpop.permute.xlu1 %437 }
 0x216   :  { %v485_v49 = vsel %vm484_vm13, 1, %v2449_v21  ;;  %v492_v18 = vsel %vm491_vm8, 1, %v2449_v21  ;;  %vm230_vm8 = vcmp.eq.s32.totalorder %v1590_v35, 1 }
 0x217   :  { %487 = vperm.xlu1 %1114, %v485_v49   ;;  %494 = vperm.xlu2 %1115, %v492_v18   ;;  %v201_v18 = vpop.f32.mrf.mxu1 }
 0x21f   :  { %1119 = vset.pattern.permute.xlu1 %v2456_v0  ;;  %1116 = vset.pattern.permute.xlu2 %v2458_v56  ;;  %v2137_v56 = vpop.permute.xlu2 %379 }
 0x220   :  { %914 = vperm.xlu1 %1119, %v912_v8  }
 0x223   :  { %v597_v55 = vpop.permute.xlu1 %596 }
 0x225   :  { %v593_v9 = vpop.permute.xlu0 %592 }
 0x226   :  { %v594_v22 = vsel %vm2471_vm7, %v593_v9, 4294967295  ;;  %vm333_vm7 = vcmp.eq.s32.totalorder %v2003_v54, 1 }
 0x227   :  { %v595_v15 = vsel %vm2472_vm3, 0, %v594_v22  ;;  %vm339_vm3 = vcmp.eq.s32.totalorder %v1992_v39, 1 }
 0x228   :  { %v598_v16 = vsel %vm1869_vm6, %v597_v55, %v595_v15  ;;  %1121 = vset.pattern.permute.xlu1 %v2473_v3  ;;  %vm2475_vm6 = vcmp.eq.s32.totalorder %v1336_v2, 1  ;;  %v906_v2 = vsel %vm1896_vm10, 1, %v2449_v21 }
 0x229   :  { %vm606_vm11 = vcmp.eq.s32.totalorder %v598_v16, 1  ;;  %vm599_vm9 = vcmp.eq.s32.totalorder %v598_v16, 0  ;;  %vm2147_vm12 = vmand %vm2475_vm6, %vm2474_vm2  ;;  %vm2481_vm2 = vnez %v2370_v57  ;;  %vm2482_vm6 = vnez %v2352_v46 }
 0x22a   :  { %v607_v11 = vsel %vm606_vm11, 1, %v2449_v21  ;;  %v600_v27 = vsel %vm599_vm9, 1, %v2449_v21  ;;  %v918_v35 = vsel %vm2147_vm12, 1, %v2449_v21  ;;  %vm2478_vm11 = vnez %v2397_v28 }
 0x22b   :  { %609 = vperm.xlu0 %1117, %v607_v11   ;;  %602 = vperm.xlu2 %1116, %v600_v27   ;;  %vm2479_vm9 = vnez %v2395_v30 }
 0x22c   :  { %v373_v15 = vpop.permute.xlu1 %372 }
 0x22d   :  { %v208_v51 = vpop.permute.xlu0 %207 }
 0x22e   :  { %vm209_vm13 = vcmp.eq.s32.totalorder %v208_v51, 1 }
 0x22f   :  { %v210_v33 = vsel %vm209_vm13, %v1582_v43, %v1584_v44  ;;  %vm2480_vm13 = vmor %vm2478_vm11, %vm2479_vm9  ;;  %vm2488_vm11 = vnez %v2434_v59  ;;  %vm2489_vm9 = vnez %v2438_v7 }
 0x230   :  { %v213_v47 = vsub.f32 1.0, %v210_v33 }
 0x231   :  { %v712_v49 = vpop.permute.xlu2 %711 }
 0x232   :  { %v231_v8 = vsel %vm230_vm8, %v213_v47, %v1595_v26  ;;  %vm2483_vm8 = vmor %vm2481_vm2, %vm2482_vm6  ;;  %vm2491_vm2 = vnez %v2411_v58 }
 0x233   :  { %v237_v9 = vsel %vm236_vm4, %v201_v18, %v231_v8  ;;  %1118 = vset.pattern.permute.xlu0 %v2456_v0  ;;  %1120 = vset.pattern.permute.xlu2 %v2456_v0  ;;  %vm2484_vm4 = vnez %v2413_v60  ;;  %vm931_vm6 = vmor %vm2113_vm15, %vm2147_vm12  ;;  %vm351_vm12 = vcmp.eq.s32.totalorder %v1999_v41, 1 }
 0x234   :  { %908 = vperm.xlu0 %1118, %v906_v2   ;;  %920 = vperm.xlu2 %1120, %v918_v35   ;;  %v243_v36 = vsel %vm242_vm5, %v1417_v34, %v237_v9  ;;  %vm2485_vm5 = vnez %v2403_v48 }
 0x235   :  { %v260_v26 = vsel %vm259_vm0, %v243_v36, %v1582_v43  ;;  %v267_v50 = vsel %vm266_vm14, %v243_v36, %v1584_v44  ;;  %v2175_v34 = vpop.permute.xlu1 %552  ;;  %vm2486_vm0 = vmor %vm2484_vm4, %vm2485_vm5  ;;  %vm2487_vm14 = vnez %v2421_v10  ;;  %vm2493_vm5 = vnez %v2430_v31 }
 0x236   :  { %v326_v63 = vmin.f32 %v260_v26, %v267_v50  ;;  %v327_v22 = vmax.f32 %v260_v26, %v267_v50  ;;  %vm2492_vm4 = vmor %vm1896_vm10, %vm1904_vm1  ;;  %vm381_vm10 = vcmp.eq.s32.totalorder %v2137_v56, 1  ;;  %vm374_vm1 = vcmp.eq.s32.totalorder %v373_v15, 1 }
 0x238   :  { %v334_v55 = vsel %vm333_vm7, %v327_v22, 0.0 }
 0x239   :  { %v2170_v16 = vpop.permute.xlu2 %667  ;;  %v340_v45 = vsel %vm339_vm3, %v326_v63, %v334_v55  ;;  %v431_v63 = vpop.f32.mrf.mxu3 }
 0x23c   :  { %1122 = vset.pattern.permute.xlu2 %v2473_v3 }
 0x242   :  { %v2173_v25 = vpop.permute.xlu2 %902 }
 0x24a   :  { %v823_v43 = vpop.permute.xlu2 %822 }
 0x24b   :  { %v827_v11 = vpop.permute.xlu0 %826  ;;  %v708_v44 = vpop.permute.xlu1 %707  ;;  %v824_v54 = vsel %vm2483_vm8, %v823_v43, 4294967295  ;;  %v2496_v43 = vld [vmem:[#allocation20_spill] sm:$0xff] }
 0x24c   :  { %v709_v39 = vsel %vm2480_vm13, %v708_v44, 4294967295  ;;  %vm2490_vm13 = vmor %vm2488_vm11, %vm2489_vm9  ;;  %vm439_vm11 = vcmp.eq.s32.totalorder %v2117_v1, 1  ;;  %vm448_vm9 = vcmp.eq.s32.totalorder %v2005_v4, 1  ;;  %v924_v4 = vsel %vm2493_vm5, 1, %v2449_v21 }
 0x24d   :  { %v710_v3 = vsel %vm2486_vm0, 0, %v709_v39  ;;  %v825_v57 = vsel %vm2490_vm13, 0, %v824_v54  ;;  %vm454_vm13 = vcmp.eq.s32.totalorder %v2015_v40, 1  ;;  %v546_v39 = vpop.f32.mrf.mxu0 }
 0x24e   :  { %v713_v27 = vsel %vm2487_vm14, %v712_v49, %v710_v3  ;;  %v828_v28 = vsel %vm2491_vm2, %v827_v11, %v825_v57  ;;  %vm345_vm14 = vcmp.eq.s32.totalorder %v2009_v13, 1  ;;  %v2497_v3 = vld [vmem:[#allocation16_spill] sm:$0xff] }
 0x24f   :  { %vm721_vm7 = vcmp.eq.s32.totalorder %v713_v27, 1  ;;  %vm714_vm3 = vcmp.eq.s32.totalorder %v713_v27, 0  ;;  %vm836_vm0 = vcmp.eq.s32.totalorder %v828_v28, 1  ;;  %vm829_vm15 = vcmp.eq.s32.totalorder %v828_v28, 0 }
 0x250   :  { %v722_v46 = vsel %vm721_vm7, 1, %v2449_v21  ;;  %v715_v30 = vsel %vm714_vm3, 1, %v2449_v21  ;;  %vm357_vm3 = vcmp.eq.s32.totalorder %v2007_v6, 1  ;;  %v837_v49 = vsel %vm836_vm0, 1, %v2449_v21 }
 0x251   :  { %724 = vperm.xlu2 %1122, %v722_v46   ;;  %717 = vperm.xlu1 %1121, %v715_v30   ;;  %v830_v13 = vsel %vm829_vm15, 1, %v2449_v21  ;;  %vm959_vm0 = vcmp.eq.s32.totalorder %v2074_v24, 1  ;;  %vm563_vm15 = vcmp.eq.s32.totalorder %v2496_v43, 1 }
 0x252   :  { %v938_v59 = vpop.permute.xlu2 %937 }
 0x253   :  { %v323_v48 = vpop.permute.xlu0 %322  ;;  %v934_v60 = vpop.permute.xlu1 %933 }
 0x254   :  { %vm324_vm8 = vcmp.eq.s32.totalorder %v323_v48, 1  ;;  %v935_v10 = vsel %vm931_vm6, %v934_v60, 4294967295  ;;  %vm460_vm6 = vcmp.eq.s32.totalorder %v2011_v37, 1  ;;  %v2495_v37 = vld [vmem:[#allocation15_spill] sm:$0xff] }
 0x255   :  { %v325_v7 = vsel %vm324_vm8, %v260_v26, %v267_v50  ;;  %v936_v51 = vsel %vm2492_vm4, 0, %v935_v10  ;;  %vm466_vm8 = vcmp.eq.s32.totalorder %v2013_v38, 1  ;;  %vm472_vm4 = vcmp.eq.s32.totalorder %v2023_v20, 1  ;;  %v2498_v60 = vld [vmem:[#allocation23_spill] sm:$0xff]  ;;  %v2499_v10 = vld [vmem:[#allocation21_spill] sm:$0xff] }
 0x256   :  { %v328_v33 = vsub.f32 1.0, %v325_v7  ;;  %v939_v58 = vsel %vm2493_vm5, %v938_v59, %v936_v51  ;;  %v960_v20 = vsel %vm959_vm0, 1, %v2449_v21  ;;  %vm554_vm5 = vcmp.eq.s32.totalorder %v2175_v34, 1  ;;  %v661_v51 = vpop.f32.mrf.mxu1 }
 0x257   :  { %vm947_vm7 = vcmp.eq.s32.totalorder %v939_v58, 1  ;;  %vm940_vm2 = vcmp.eq.s32.totalorder %v939_v58, 0  ;;  %vm702_vm0 = vcmp.eq.s32.totalorder %v2067_v19, 1 }
 0x258   :  { %v346_v47 = vsel %vm345_vm14, %v328_v33, %v340_v45  ;;  %v948_v5 = vsel %vm947_vm7, 1, %v2449_v21  ;;  %v941_v1 = vsel %vm940_vm2, 1, %v2449_v21  ;;  %vm678_vm2 = vcmp.eq.s32.totalorder %v2498_v60, 1  ;;  %v2500_v33 = vld [vmem:[#allocation22_spill] sm:$0xff] }
 0x259   :  { %v352_v12 = vsel %vm351_vm12, %v316_v61, %v346_v47  ;;  %1125 = vset.pattern.permute.xlu2 %v2494_v14  ;;  %1123 = vset.pattern.permute.xlu1 %v2494_v14  ;;  %vm569_vm12 = vcmp.eq.s32.totalorder %v2025_v29, 1  ;;  %v2501_v61 = vld [vmem:[#allocation18_spill] sm:$0xff] }
 0x25a   :  { %950 = vperm.xlu0 %1118, %v948_v5   ;;  %839 = vperm.xlu2 %1125, %v837_v49   ;;  %v358_v41 = vsel %vm357_vm3, %v1438_v42, %v352_v12  ;;  %vm575_vm3 = vcmp.eq.s32.totalorder %v2027_v17, 1 }
 0x25b   :  { %832 = vperm.xlu1 %1123, %v830_v13   ;;  %v382_v6 = vsel %vm381_vm10, %v358_v41, %v267_v50  ;;  %v375_v18 = vsel %vm374_vm1, %v358_v41, %v260_v26  ;;  %v2241_v22 = vpop.permute.xlu1 %893  ;;  %vm581_vm10 = vcmp.eq.s32.totalorder %v2030_v62, 1  ;;  %vm587_vm1 = vcmp.eq.s32.totalorder %v2032_v53, 1  ;;  %v783_v46 = vpop.permute.xlu0 %782 }
 0x25c   :  { %v440_v8 = vsel %vm439_vm11, %v375_v18, %v382_v6  ;;  %v441_v9 = vmin.f32 %v375_v18, %v382_v6  ;;  %v442_v2 = vmax.f32 %v375_v18, %v382_v6 }
 0x25d   :  { %v443_v35 = vsub.f32 1.0, %v440_v8  ;;  %v2502_v8 = vld [vmem:[#allocation24_spill] sm:$0xff] }
 0x25e   :  { %v449_v56 = vsel %vm448_vm9, %v442_v2, 0.0 }
 0x25f   :  { %v455_v36 = vsel %vm454_vm13, %v441_v9, %v449_v56  ;;  %vm669_vm13 = vcmp.eq.s32.totalorder %v2170_v16, 1  ;;  %v2503_v56 = vld [vmem:[#allocation26_spill] sm:$0xff] }
 0x260   :  { %v461_v42 = vsel %vm460_vm6, %v443_v35, %v455_v36  ;;  %vm684_vm6 = vcmp.eq.s32.totalorder %v2063_v32, 1  ;;  %v776_v35 = vpop.f32.mrf.mxu2 }
 0x261   :  { %v467_v26 = vsel %vm466_vm8, %v431_v63, %v461_v42  ;;  %vm690_vm8 = vcmp.eq.s32.totalorder %v2499_v10, 1  ;;  %v1292_v63 = vmov 3.0   ;;  %v2504_v42 = vld [vmem:[#allocation25_spill] sm:$0xff] }
 0x262   :  { %1126 = vset.pattern.permute.xlu2 %v2456_v0  ;;  %1128 = vset.pattern.permute.xlu0 %v2449_v21  ;;  %v473_v40 = vsel %vm472_vm4, %v2495_v37, %v467_v26  ;;  %vm696_vm4 = vcmp.eq.s32.totalorder %v2500_v33, 1  ;;  %1129 = vrcp.f32 %v1292_v63  ;;  %v2505_v26 = vld [vmem:[#allocation17_spill] sm:$0xff] }
 0x263   :  { %1124 = vset.pattern.permute.xlu1 %v2456_v0  ;;  %943 = vperm.xlu2 %1126, %v941_v1  }
 0x264   :  { %926 = vperm.xlu1 %1124, %v924_v4  }
 0x26c   :  { %1127 = vset.pattern.permute.xlu1 %v2449_v21 }
 0x26d   :  { %962 = vperm.xlu1 %1127, %v960_v20   ;;  %v1130_v20 = vpop.eup %1129 }
 0x271   :  { %v495_v38 = vpop.permute.xlu2 %494 }
 0x272   :  { %vm496_vm14 = vcmp.eq.s32.totalorder %v495_v38, 1 }
 0x273   :  { %v497_v50 = vsel %vm496_vm14, %v473_v40, %v382_v6 }
 0x285   :  { %v603_v11 = vpop.permute.xlu2 %602 }
 0x286   :  { %vm604_vm11 = vcmp.eq.s32.totalorder %v603_v11, 1  ;;  %v887_v11 = vpop.f32.mrf.mxu3 }
 0x289   :  { %v488_v0 = vpop.permute.xlu1 %487 }
 0x28a   :  { %vm489_vm7 = vcmp.eq.s32.totalorder %v488_v0, 1 }
 0x28b   :  { %v490_v31 = vsel %vm489_vm7, %v473_v40, %v375_v18 }
 0x28c   :  { %v555_v55 = vsel %vm554_vm5, %v490_v31, %v497_v50  ;;  %v556_v15 = vmin.f32 %v490_v31, %v497_v50  ;;  %v557_v45 = vmax.f32 %v490_v31, %v497_v50  ;;  %vm784_vm5 = vcmp.eq.s32.totalorder %v783_v46, 1 }
 0x28d   :  { %v558_v24 = vsub.f32 1.0, %v555_v55 }
 0x28e   :  { %v564_v21 = vsel %vm563_vm15, %v557_v45, 0.0  ;;  %v921_v59 = vpop.permute.xlu2 %920  ;;  %vm793_vm15 = vcmp.eq.s32.totalorder %v2091_v23, 1  ;;  %v970_v45 = vmul.f32 3.0, %v1130_v20 }
 0x28f   :  { %v570_v44 = vsel %vm569_vm12, %v556_v15, %v564_v21  ;;  %vm799_vm12 = vcmp.eq.s32.totalorder %v2502_v8, 1 }
 0x290   :  { %v576_v54 = vsel %vm575_vm3, %v558_v24, %v570_v44  ;;  %vm805_vm3 = vcmp.eq.s32.totalorder %v2107_v52, 1 }
 0x291   :  { %v582_v34 = vsel %vm581_vm10, %v546_v39, %v576_v54  ;;  %vm811_vm10 = vcmp.eq.s32.totalorder %v2503_v56, 1  ;;  %v971_v39 = vsub.f32 1.0, %v970_v45  ;;  %v2506_v54 = vld [vmem:[#allocation19_spill] sm:$0xff] }
 0x292   :  { %v588_v27 = vsel %vm587_vm1, %v2497_v3, %v582_v34  ;;  %v915_v14 = vpop.permute.xlu1 %914  ;;  %vm817_vm1 = vcmp.eq.s32.totalorder %v2504_v42, 1 }
 0x293   :  { %v605_v57 = vsel %vm604_vm11, %v588_v27, %v490_v31 }
 0x29d   :  { %v610_v30 = vpop.permute.xlu0 %609 }
 0x29e   :  { %vm611_vm9 = vcmp.eq.s32.totalorder %v610_v30, 1  ;;  %v967_v30 = vld [vmem:[#allocation8] sm:$0xff] }
 0x29f   :  { %v612_v29 = vsel %vm611_vm9, %v588_v27, %v497_v50  ;;  %v972_v27 = vmul.f32 %v1130_v20, %v971_v39 }
 0x2a0   :  { %v670_v17 = vsel %vm669_vm13, %v605_v57, %v612_v29  ;;  %v671_v28 = vmin.f32 %v605_v57, %v612_v29  ;;  %v672_v48 = vmax.f32 %v605_v57, %v612_v29  ;;  %vm895_vm13 = vcmp.eq.s32.totalorder %v2241_v22, 1 }
 0x2a1   :  { %v673_v62 = vsub.f32 1.0, %v670_v17 }
 0x2a2   :  { %v679_v53 = vsel %vm678_vm2, %v672_v48, 0.0  ;;  %vm904_vm2 = vcmp.eq.s32.totalorder %v2173_v25, 1 }
 0x2a3   :  { %v685_v7 = vsel %vm684_vm6, %v671_v28, %v679_v53 }
 0x2a4   :  { %v691_v58 = vsel %vm690_vm8, %v673_v62, %v685_v7  ;;  %vm916_vm8 = vcmp.eq.s32.totalorder %v915_v14, 1 }
 0x2a5   :  { %v697_v16 = vsel %vm696_vm4, %v661_v51, %v691_v58  ;;  %vm922_vm4 = vcmp.eq.s32.totalorder %v921_v59, 1 }
 0x2a6   :  { %v703_v47 = vsel %vm702_vm0, %v2501_v61, %v697_v16  ;;  %v909_v4 = vpop.permute.xlu0 %908 }
 0x2a7   :  { %vm910_vm6 = vcmp.eq.s32.totalorder %v909_v4, 1 }
 0x2ab   :  { %v725_v5 = vpop.permute.xlu2 %724 }
 0x2ac   :  { %vm726_vm14 = vcmp.eq.s32.totalorder %v725_v5, 1 }
 0x2ad   :  { %v727_v12 = vsel %vm726_vm14, %v703_v47, %v612_v29 }
 0x2b4   :  { %v840_v9 = vpop.permute.xlu2 %839 }
 0x2b5   :  { %vm841_vm11 = vcmp.eq.s32.totalorder %v840_v9, 1 }
 0x2bd   :  { %v944_v24 = vpop.permute.xlu2 %943 }
 0x2be   :  { %vm945_vm14 = vcmp.eq.s32.totalorder %v944_v24, 1 }
 0x2c3   :  { %v718_v49 = vpop.permute.xlu1 %717 }
 0x2c4   :  { %vm719_vm7 = vcmp.eq.s32.totalorder %v718_v49, 1 }
 0x2c5   :  { %v720_v32 = vsel %vm719_vm7, %v703_v47, %v605_v57  ;;  %v973_v57 = vadd.f32 %v1130_v20, %v972_v27 }
 0x2c6   :  { %v785_v13 = vsel %vm784_vm5, %v720_v32, %v727_v12  ;;  %v786_v41 = vmin.f32 %v720_v32, %v727_v12  ;;  %v787_v6 = vmax.f32 %v720_v32, %v727_v12  ;;  %vm974_vm5 = vweird.f32 %v1130_v20 }
 0x2c7   :  { %v788_v18 = vsub.f32 1.0, %v785_v13  ;;  %v975_v28 = vsel %vm974_vm5, %v1130_v20, %v973_v57 }
 0x2c8   :  { %v794_v19 = vsel %vm793_vm15, %v787_v6, 0.0 }
 0x2c9   :  { %v800_v2 = vsel %vm799_vm12, %v786_v41, %v794_v19 }
 0x2ca   :  { %v806_v36 = vsel %vm805_vm3, %v788_v18, %v800_v2 }
 0x2cb   :  { %v812_v1 = vsel %vm811_vm10, %v776_v35, %v806_v36 }
 0x2cc   :  { %v818_v23 = vsel %vm817_vm1, %v2505_v26, %v812_v1  ;;  %v951_v21 = vpop.permute.xlu0 %950 }
 0x2cd   :  { %v842_v37 = vsel %vm841_vm11, %v818_v23, %v727_v12  ;;  %v833_v40 = vpop.permute.xlu1 %832  ;;  %vm952_vm7 = vcmp.eq.s32.totalorder %v951_v21, 1 }
 0x2ce   :  { %vm834_vm9 = vcmp.eq.s32.totalorder %v833_v40, 1 }
 0x2cf   :  { %v835_v52 = vsel %vm834_vm9, %v818_v23, %v720_v32 }
 0x2d0   :  { %v896_v38 = vsel %vm895_vm13, %v835_v52, %v842_v37  ;;  %v897_v50 = vmin.f32 %v835_v52, %v842_v37  ;;  %v898_v0 = vmax.f32 %v835_v52, %v842_v37 }
 0x2d1   :  { %v899_v31 = vsub.f32 1.0, %v896_v38 }
 0x2d2   :  { %v905_v55 = vsel %vm904_vm2, %v898_v0, 0.0 }
 0x2d3   :  { %v911_v15 = vsel %vm910_vm6, %v897_v50, %v905_v55 }
 0x2d4   :  { %v917_v43 = vsel %vm916_vm8, %v899_v31, %v911_v15 }
 0x2d5   :  { %v923_v22 = vsel %vm922_vm4, %v887_v11, %v917_v43 }
 0x2d6   :  { %v927_v44 = vpop.permute.xlu1 %926 }
 0x2d7   :  { %vm928_vm0 = vcmp.eq.s32.totalorder %v927_v44, 1 }
 0x2d8   :  { %v929_v34 = vsel %vm928_vm0, %v2506_v54, %v923_v22 }
 0x2d9   :  { %v946_v25 = vsel %vm945_vm14, %v929_v34, %v835_v52  ;;  %v953_v3 = vsel %vm952_vm7, %v929_v34, %v842_v37 }
 0x2df   :  { %v963_v46 = vpop.permute.xlu1 %962 }
 0x2e0   :  { %vm964_vm15 = vcmp.eq.s32.totalorder %v963_v46, 1 }
 0x2e1   :  { %v965_v29 = vsel %vm964_vm15, %v946_v25, %v953_v3 }
 0x2e2   :  { %v966_v17 = vmul.f32 2.0, %v965_v29 }
 0x2e4   :  { %v968_v48 = vadd.f32 %v967_v30, %v966_v17 }
 0x2e6   :  { %v976_v60 = vmul.f32 %v975_v28, %v968_v48 }
 0x2e8   :  { %v978_v62 = vsub.f32 1.0, %v976_v60  ;;  %v977_v47 = vadd.f32 1e-10, %v976_v60 }
 0x2ea   :  { %v979_v53 = vadd.f32 1e-10, %v978_v62 }
 0x2ec   :  { %1131 = vrcp.f32 %v979_v53  ;;  %v991_v51 = vand.u32 2147483648, %v979_v53  ;;  %v989_v58 = vand.u32 2147483647, %v979_v53  ;;  %vm985_vm3 = vweird.f32 %v979_v53 }
 0x2ee   :  { %v992_v61 = vor.u32 1.1754944e-38, %v991_v51  ;;  %vm990_vm1 = vcmp.eq.f32.partialorder %v989_v58, 8.507059e+37 }
 0x2f2   :  { %v1132_v10 = vpop.eup %1131 }
 0x2f3   :  { %v981_v59 = vmul.f32 %v1132_v10, %v979_v53  ;;  %vm986_vm12 = vweird.f32 %v1132_v10 }
 0x2f4   :  { %vm987_vm10 = vmor %vm985_vm3, %vm986_vm12 }
 0x2f5   :  { %v982_v7 = vsub.f32 1.0, %v981_v59 }
 0x2f7   :  { %v983_v33 = vmul.f32 %v1132_v10, %v982_v7 }
 0x2f9   :  { %v984_v16 = vadd.f32 %v1132_v10, %v983_v33 }
 0x2fb   :  { %v988_v5 = vsel %vm987_vm10, %v1132_v10, %v984_v16 }
 0x2fc   :  { %v993_v12 = vsel %vm990_vm1, %v992_v61, %v988_v5 }
 0x2fd   :  { %v994_v14 = vmul.f32 %v993_v12, %v977_v47 }
 0x2ff   :  { %1133 = vlog2.f32 %v994_v14 }
 0x305   :  { %v1134_v49 = vpop.eup %1133 }
 0x306   :  { %v996_v32 = vmul.f32 0.6931472, %v1134_v49 }
 0x308   :  { %997 = vst [vmem:[#allocation10] sm:$0xff] %v996_v32 }
 0x309   :  { %1008 = dma.vmem_to_hbm [thread:$0]  %s1004_s20, 128, %s1006_s23, [#allocation4]  }
 0x30a   :  { %1261 = dma.done.wait [#allocation4], 128  }
 0x30b   :  { %1262 = vsyncadd [#allocation4], 4294967168 }
 0x30c   :  { %1013 = vsyncpa [#allocation3], 1 }
 0x30d   :  { %1014 = vsyncpa [#allocation6], 1 }
 0x30e   :  { %1015 = vsyncpa [#allocation9], 1 }
 0x30f   :  { %1016 = vsyncpa [#allocation4], 1 }

</bundles_post_ra>
